<compile_context>
chip_gen: v6e
topology: v6e:2x2x1
jax: 0.10.0
libtpu: 0.0.40
codegen_flags: <defaults>
</compile_context>

<pallas_src>
import functools

import jax
import jax.numpy as jnp
from jax.experimental import pallas as pl
from jax.experimental.pallas import tpu as pltpu


def _make_deconv_kernel(*, cin, cout, h, w, k, g, has_residual):
    """Build a kernel specialized to static shapes; g = images packed per grid step."""
    ho = h + k - 1           # output height (stride=1, pad=0 conv-transpose)
    wo = w + k - 1           # valid output width
    wp = w + 2 * (k - 1)     # fully padded input width (= flat lane stride)
    l_img = ho * wp          # per-image lane-dense slab length (Wo..Wp cols are garbage)
    l_all = g * l_img        # lanes per grid step
    kc = k * cin             # contraction depth of each of the K matmuls

    def kernel(x_ref, w_ref, b_ref, *rest):
        if has_residual:
            r_ref, o_ref, xf5_ref = rest
        else:
            o_ref, xf5_ref = rest
            r_ref = None

        # Trailing K-1 slack lanes only ever multiply into discarded columns; keep them
        # zero with one tiny store (no full-scratch zero-fill is needed: all other lanes
        # are fully overwritten below with already-padded data).
        xf5_ref[:, l_all:l_all + k - 1] = jnp.zeros((kc, k - 1), jnp.float32)

        # 1) K row-shifted blocks of the padded input (the only scratch writes):
        #    xf5[kh*Cin + c, m*Limg + a] = x_pad_flat[m, c, a + kh*Wp].
        #    x arrives fully padded & flat, so each copy is one contiguous lane slice.
        for m in range(g):
            base = m * l_img
            for kh in range(k):
                xf5_ref[kh * cin:(kh + 1) * cin, base:base + l_img] = (
                    x_ref[m, :, kh * wp:kh * wp + l_img])

        # 2) K accumulated MXU matmuls; the kw tap shift is a pure lane slice of xf5
        #    (cross-image / end-of-row leakage only lands in the discarded columns).
        acc = None
        for kw in range(k):
            part = jnp.dot(w_ref[kw], xf5_ref[:, kw:kw + l_all],
                           preferred_element_type=jnp.float32)
            acc = part if acc is None else acc + part
        acc = acc + b_ref[...]                       # (Cout, 1) broadcast over lanes

        # 3) Epilogue on the whole slab: residual + ReLU, one wide store per image.
        for m in range(g):
            row = acc[:, m * l_img:(m + 1) * l_img]
            if r_ref is not None:
                row = row + r_ref[m].astype(jnp.float32)
            o_ref[m] = jnp.maximum(row, 0.0).astype(o_ref.dtype)

    scratch = [pltpu.VMEM((kc, l_all + k - 1), jnp.float32)]
    return kernel, scratch


@functools.partial(jax.jit, static_argnames=("bn", "images_per_step"))
def _deconv_block_impl(x, weight, bias, residual, bn, bn_params, images_per_step):
    n, cin, h, w = x.shape
    cout = weight.shape[1]
    k = weight.shape[2]
    g = images_per_step
    ho, wo = h + k - 1, w + k - 1
    hp, wp = h + 2 * (k - 1), w + 2 * (k - 1)
    l_img = ho * wp

    if bn:
        if bn_params is None:
            raise ValueError("bn=True requires bn_params=(gamma, beta, mean, var, eps)")
        gamma, beta, mean, var, eps = bn_params
        scale = gamma / jnp.sqrt(var + eps)
        weight = weight * scale[None, :, None, None]
        bias = bias * scale + (beta - mean * scale)

    # Lane-dense, fully zero-padded flat input: (N, Cin, Hp*Wp). Tiny wrapper pad
    # (layout plumbing) buys contiguous in-kernel copies and removes all zero-fill.
    x_flat = jnp.pad(x, ((0, 0), (0, 0), (k - 1, k - 1), (k - 1, k - 1)))
    x_flat = x_flat.reshape(n, cin, hp * wp)

    # Pack weights per kw tap: w_pack[kw, co, kh*Cin + c] = weight[c, co, K-1-kh, K-1-kw]
    # (ConvTranspose2d == full correlation with the spatially flipped kernel).
    w_flip = weight[:, :, ::-1, ::-1]                        # (Cin, Cout, K, K)
    w_pack = jnp.transpose(w_flip, (3, 1, 2, 0)).reshape(k, cout, k * cin)
    b2d = bias.reshape(cout, 1).astype(jnp.float32)

    has_residual = residual is not None
    if has_residual:
        # Residual in the same (Ho, Wp)-flat lane space as the accumulator slab.
        r_flat = jnp.pad(residual, ((0, 0), (0, 0), (0, 0), (0, wp - wo)))
        r_flat = r_flat.reshape(n, cout, l_img)

    kernel, scratch_shapes = _make_deconv_kernel(
        cin=cin, cout=cout, h=h, w=w, k=k, g=g, has_residual=has_residual)

    x_spec = pl.BlockSpec((g, cin, hp * wp), lambda b: (b, 0, 0))
    w_spec = pl.BlockSpec((k, cout, k * cin), lambda b: (0, 0, 0))
    b_spec = pl.BlockSpec((cout, 1), lambda b: (0, 0))
    o_spec = pl.BlockSpec((g, cout, l_img), lambda b: (b, 0, 0))

    in_specs = [x_spec, w_spec, b_spec]
    args = [x_flat, w_pack, b2d]
    if has_residual:
        in_specs.append(pl.BlockSpec((g, cout, l_img), lambda b: (b, 0, 0)))
        args.append(r_flat)

    out_flat = pl.pallas_call(
        kernel,
        out_shape=jax.ShapeDtypeStruct((n, cout, l_img), x.dtype),
        grid_spec=pltpu.PrefetchScalarGridSpec(
            num_scalar_prefetch=0,
            grid=(n // g,),
            in_specs=in_specs,
            out_specs=o_spec,
            scratch_shapes=scratch_shapes,
        ),
        compiler_params=pltpu.CompilerParams(dimension_semantics=("parallel",)),
    )(*args)

    # Wp -> Wo extraction: the garbage columns of the slab never leave the wrapper.
    return out_flat.reshape(n, cout, ho, wp)[..., :wo]


def _tensorcores_per_device():
    """v7x exposes 2 TensorCores behind one device; v5e/v6e expose 1."""
    try:
        kind = jax.devices()[0].device_kind.lower()
    except Exception:
        return 1
    return 2 if "v7" in kind else 1


def _pick_images_per_step(n):
    tc = _tensorcores_per_device()
    if tc <= 1:
        return n                       # single TC: one grid step, whole batch on lanes
    for steps in range(tc, n + 1):     # dual TC (v7x): keep >= tc parallel grid steps
        if n % steps == 0:
            return n // steps
    return 1


def deconv_block_forward(x, weight, bias, residual=None, bn=False, bn_params=None,
                         images_per_step=None):
    """Forward pass of DeconvBlock.

    x:        (N, Cin, H, W)    float32, NCHW (PyTorch convention)
    weight:   (Cin, Cout, K, K) float32 (PyTorch ConvTranspose2d weight layout)
    bias:     (Cout,)           float32
    residual: optional (N, Cout, H+K-1, W+K-1) NCHW
    bn:       if True, eval-mode BatchNorm2d is folded into weight/bias
              (bn_params = (gamma, beta, running_mean, running_var, eps)).
    Returns (N, Cout, H+K-1, W+K-1) NCHW.
    """
    n = x.shape[0]
    if images_per_step is None:
        images_per_step = _pick_images_per_step(n)
    if n % images_per_step != 0:
        raise ValueError("images_per_step must divide the batch size")
    return _deconv_block_impl(x, weight, bias, residual, bn=bn, bn_params=bn_params,
                              images_per_step=images_per_step)


if __name__ == "__main__":
    key = jax.random.PRNGKey(0)
    k1, k2, k3, k4 = jax.random.split(key, 4)

    N, Cin, Cout, H, W, K = 2, 4, 8, 16, 16, 5
    x = jax.random.normal(k1, (N, Cin, H, W), dtype=jnp.float32)
    weight = jax.random.normal(k2, (Cin, Cout, K, K), dtype=jnp.float32) * 0.1
    bias = jax.random.normal(k3, (Cout,), dtype=jnp.float32) * 0.1
    residual = jax.random.normal(k4, (N, Cout, H + K - 1, W + K - 1), dtype=jnp.float32)

    # Pallas kernel: auto grid choice, plus both explicit batching modes
    # (1 image/step = v7x-style 2 parallel steps; N images/step = v5e/v6e-style 1 step).
    out = jax.block_until_ready(deconv_block_forward(x, weight, bias, residual=residual))
    out_nores = jax.block_until_ready(deconv_block_forward(x, weight, bias))
    out_g1 = jax.block_until_ready(
        deconv_block_forward(x, weight, bias, residual=residual, images_per_step=1))
    out_gn = jax.block_until_ready(
        deconv_block_forward(x, weight, bias, residual=residual, images_per_step=N))

    # Pure-JAX reference (ConvTranspose2d == full correlation with flipped kernel).
    w_conv = jnp.transpose(weight, (1, 0, 2, 3))[:, :, ::-1, ::-1]  # OIHW
    ref_conv = jax.lax.conv_general_dilated(
        x, w_conv, window_strides=(1, 1),
        padding=[(K - 1, K - 1), (K - 1, K - 1)],
        dimension_numbers=("NCHW", "OIHW", "NCHW"),
    ) + bias[None, :, None, None]
    ref = jnp.maximum(ref_conv + residual, 0.0)
    ref_nores = jnp.maximum(ref_conv, 0.0)

    assert out.shape == (N, Cout, H + K - 1, W + K - 1)
    assert jnp.allclose(out, ref, atol=1e-4, rtol=1e-4)
    assert jnp.allclose(out_nores, ref_nores, atol=1e-4, rtol=1e-4)
    assert jnp.allclose(out_g1, ref, atol=1e-4, rtol=1e-4)
    assert jnp.allclose(out_gn, ref, atol=1e-4, rtol=1e-4)
    print("KERNEL_OK")
</pallas_src>

<mosaic_0001>
module attributes {stable_mosaic.version = 11 : i64} {
  func.func @kernel(%arg0: i32, %arg1: memref<2x4x576xf32, #tpu.memory_space<vmem>>, %arg2: memref<5x8x20xf32, #tpu.memory_space<vmem>>, %arg3: memref<8x1xf32, #tpu.memory_space<vmem>>, %arg4: memref<2x8x480xf32, #tpu.memory_space<vmem>>, %arg5: memref<2x8x480xf32, #tpu.memory_space<vmem>>, %arg6: memref<20x964xf32, #tpu.memory_space<vmem>>) attributes {dimension_semantics = [#tpu.dimension_semantics<parallel>], iteration_bounds = array<i64: 1>, scalar_prefetch = 0 : i64, scratch_operands = 1 : i64, tpu.core_type = #tpu.core_type<tc>, window_params = [{transform_indices = @transform_0, window_bounds = array<i64: 2, 4, 576>}, {pipeline_mode = #tpu.pipeline_mode<synchronous>, transform_indices = @transform_1, window_bounds = array<i64: 5, 8, 20>}, {pipeline_mode = #tpu.pipeline_mode<synchronous>, transform_indices = @transform_2, window_bounds = array<i64: 8, 1>}, {transform_indices = @transform_3, window_bounds = array<i64: 2, 8, 480>}, {transform_indices = @transform_4, window_bounds = array<i64: 2, 8, 480>}]} {
    %cst = arith.constant 0.000000e+00 : f32
    %0 = vector.broadcast %cst : f32 to vector<20x4xf32>
    %c0 = arith.constant 0 : index
    %c960 = arith.constant 960 : index
    %1 = vector.load %arg6[%c0, %c960] : memref<20x964xf32, #tpu.memory_space<vmem>>, vector<20x4xf32>
    tpu.vector_store %arg6[%c0, %c960], %0 {strides = array<i32>} : memref<20x964xf32, #tpu.memory_space<vmem>>, vector<20x4xf32>,
    %c0_0 = arith.constant 0 : index
    %c0_1 = arith.constant 0 : index
    %c0_2 = arith.constant 0 : index
    %2 = vector.load %arg1[%c0_0, %c0_1, %c0_2] : memref<2x4x576xf32, #tpu.memory_space<vmem>>, vector<1x4x480xf32>
    %3 = vector.shape_cast %2 : vector<1x4x480xf32> to vector<4x480xf32>
    %c0_3 = arith.constant 0 : index
    %c0_4 = arith.constant 0 : index
    %4 = vector.load %arg6[%c0_3, %c0_4] : memref<20x964xf32, #tpu.memory_space<vmem>>, vector<4x480xf32>
    tpu.vector_store %arg6[%c0_3, %c0_4], %3 {strides = array<i32>} : memref<20x964xf32, #tpu.memory_space<vmem>>, vector<4x480xf32>,
    %c0_5 = arith.constant 0 : index
    %c0_6 = arith.constant 0 : index
    %c24 = arith.constant 24 : index
    %5 = vector.load %arg1[%c0_5, %c0_6, %c24] : memref<2x4x576xf32, #tpu.memory_space<vmem>>, vector<1x4x480xf32>
    %6 = vector.shape_cast %5 : vector<1x4x480xf32> to vector<4x480xf32>
    %c4 = arith.constant 4 : index
    %c0_7 = arith.constant 0 : index
    %7 = vector.load %arg6[%c4, %c0_7] : memref<20x964xf32, #tpu.memory_space<vmem>>, vector<4x480xf32>
    tpu.vector_store %arg6[%c4, %c0_7], %6 {strides = array<i32>} : memref<20x964xf32, #tpu.memory_space<vmem>>, vector<4x480xf32>,
    %c0_8 = arith.constant 0 : index
    %c0_9 = arith.constant 0 : index
    %c48 = arith.constant 48 : index
    %8 = vector.load %arg1[%c0_8, %c0_9, %c48] : memref<2x4x576xf32, #tpu.memory_space<vmem>>, vector<1x4x480xf32>
    %9 = vector.shape_cast %8 : vector<1x4x480xf32> to vector<4x480xf32>
    %c8 = arith.constant 8 : index
    %c0_10 = arith.constant 0 : index
    %10 = vector.load %arg6[%c8, %c0_10] : memref<20x964xf32, #tpu.memory_space<vmem>>, vector<4x480xf32>
    tpu.vector_store %arg6[%c8, %c0_10], %9 {strides = array<i32>} : memref<20x964xf32, #tpu.memory_space<vmem>>, vector<4x480xf32>,
    %c0_11 = arith.constant 0 : index
    %c0_12 = arith.constant 0 : index
    %c72 = arith.constant 72 : index
    %11 = vector.load %arg1[%c0_11, %c0_12, %c72] : memref<2x4x576xf32, #tpu.memory_space<vmem>>, vector<1x4x480xf32>
    %12 = vector.shape_cast %11 : vector<1x4x480xf32> to vector<4x480xf32>
    %c12 = arith.constant 12 : index
    %c0_13 = arith.constant 0 : index
    %13 = vector.load %arg6[%c12, %c0_13] : memref<20x964xf32, #tpu.memory_space<vmem>>, vector<4x480xf32>
    tpu.vector_store %arg6[%c12, %c0_13], %12 {strides = array<i32>} : memref<20x964xf32, #tpu.memory_space<vmem>>, vector<4x480xf32>,
    %c0_14 = arith.constant 0 : index
    %c0_15 = arith.constant 0 : index
    %c96 = arith.constant 96 : index
    %14 = vector.load %arg1[%c0_14, %c0_15, %c96] : memref<2x4x576xf32, #tpu.memory_space<vmem>>, vector<1x4x480xf32>
    %15 = vector.shape_cast %14 : vector<1x4x480xf32> to vector<4x480xf32>
    %c16 = arith.constant 16 : index
    %c0_16 = arith.constant 0 : index
    %16 = vector.load %arg6[%c16, %c0_16] : memref<20x964xf32, #tpu.memory_space<vmem>>, vector<4x480xf32>
    tpu.vector_store %arg6[%c16, %c0_16], %15 {strides = array<i32>} : memref<20x964xf32, #tpu.memory_space<vmem>>, vector<4x480xf32>,
    %c1 = arith.constant 1 : index
    %c0_17 = arith.constant 0 : index
    %c0_18 = arith.constant 0 : index
    %17 = vector.load %arg1[%c1, %c0_17, %c0_18] : memref<2x4x576xf32, #tpu.memory_space<vmem>>, vector<1x4x480xf32>
    %18 = vector.shape_cast %17 : vector<1x4x480xf32> to vector<4x480xf32>
    %c0_19 = arith.constant 0 : index
    %c480 = arith.constant 480 : index
    %19 = vector.load %arg6[%c0_19, %c480] : memref<20x964xf32, #tpu.memory_space<vmem>>, vector<4x480xf32>
    tpu.vector_store %arg6[%c0_19, %c480], %18 {strides = array<i32>} : memref<20x964xf32, #tpu.memory_space<vmem>>, vector<4x480xf32>,
    %c1_20 = arith.constant 1 : index
    %c0_21 = arith.constant 0 : index
    %c24_22 = arith.constant 24 : index
    %20 = vector.load %arg1[%c1_20, %c0_21, %c24_22] : memref<2x4x576xf32, #tpu.memory_space<vmem>>, vector<1x4x480xf32>
    %21 = vector.shape_cast %20 : vector<1x4x480xf32> to vector<4x480xf32>
    %c4_23 = arith.constant 4 : index
    %c480_24 = arith.constant 480 : index
    %22 = vector.load %arg6[%c4_23, %c480_24] : memref<20x964xf32, #tpu.memory_space<vmem>>, vector<4x480xf32>
    tpu.vector_store %arg6[%c4_23, %c480_24], %21 {strides = array<i32>} : memref<20x964xf32, #tpu.memory_space<vmem>>, vector<4x480xf32>,
    %c1_25 = arith.constant 1 : index
    %c0_26 = arith.constant 0 : index
    %c48_27 = arith.constant 48 : index
    %23 = vector.load %arg1[%c1_25, %c0_26, %c48_27] : memref<2x4x576xf32, #tpu.memory_space<vmem>>, vector<1x4x480xf32>
    %24 = vector.shape_cast %23 : vector<1x4x480xf32> to vector<4x480xf32>
    %c8_28 = arith.constant 8 : index
    %c480_29 = arith.constant 480 : index
    %25 = vector.load %arg6[%c8_28, %c480_29] : memref<20x964xf32, #tpu.memory_space<vmem>>, vector<4x480xf32>
    tpu.vector_store %arg6[%c8_28, %c480_29], %24 {strides = array<i32>} : memref<20x964xf32, #tpu.memory_space<vmem>>, vector<4x480xf32>,
    %c1_30 = arith.constant 1 : index
    %c0_31 = arith.constant 0 : index
    %c72_32 = arith.constant 72 : index
    %26 = vector.load %arg1[%c1_30, %c0_31, %c72_32] : memref<2x4x576xf32, #tpu.memory_space<vmem>>, vector<1x4x480xf32>
    %27 = vector.shape_cast %26 : vector<1x4x480xf32> to vector<4x480xf32>
    %c12_33 = arith.constant 12 : index
    %c480_34 = arith.constant 480 : index
    %28 = vector.load %arg6[%c12_33, %c480_34] : memref<20x964xf32, #tpu.memory_space<vmem>>, vector<4x480xf32>
    tpu.vector_store %arg6[%c12_33, %c480_34], %27 {strides = array<i32>} : memref<20x964xf32, #tpu.memory_space<vmem>>, vector<4x480xf32>,
    %c1_35 = arith.constant 1 : index
    %c0_36 = arith.constant 0 : index
    %c96_37 = arith.constant 96 : index
    %29 = vector.load %arg1[%c1_35, %c0_36, %c96_37] : memref<2x4x576xf32, #tpu.memory_space<vmem>>, vector<1x4x480xf32>
    %30 = vector.shape_cast %29 : vector<1x4x480xf32> to vector<4x480xf32>
    %c16_38 = arith.constant 16 : index
    %c480_39 = arith.constant 480 : index
    %31 = vector.load %arg6[%c16_38, %c480_39] : memref<20x964xf32, #tpu.memory_space<vmem>>, vector<4x480xf32>
    tpu.vector_store %arg6[%c16_38, %c480_39], %30 {strides = array<i32>} : memref<20x964xf32, #tpu.memory_space<vmem>>, vector<4x480xf32>,
    %c0_40 = arith.constant 0 : index
    %c0_41 = arith.constant 0 : index
    %c0_42 = arith.constant 0 : index
    %32 = vector.load %arg2[%c0_40, %c0_41, %c0_42] : memref<5x8x20xf32, #tpu.memory_space<vmem>>, vector<1x8x20xf32>
    %33 = vector.shape_cast %32 : vector<1x8x20xf32> to vector<8x20xf32>
    %c0_43 = arith.constant 0 : index
    %c0_44 = arith.constant 0 : index
    %34 = vector.load %arg6[%c0_43, %c0_44] : memref<20x964xf32, #tpu.memory_space<vmem>>, vector<20x960xf32>
    %cst_45 = arith.constant dense<0.000000e+00> : vector<8x960xf32>
    %35 = tpu.matmul %33, %34, %cst_45 {dimension_numbers = #tpu.dot_dimension_numbers<[1], [0], [0], [1], [0, 0, 1, 1], [], []>} : vector<8x20xf32>, vector<20x960xf32>, vector<8x960xf32> -> vector<8x960xf32>
    %c1_46 = arith.constant 1 : index
    %c0_47 = arith.constant 0 : index
    %c0_48 = arith.constant 0 : index
    %36 = vector.load %arg2[%c1_46, %c0_47, %c0_48] : memref<5x8x20xf32, #tpu.memory_space<vmem>>, vector<1x8x20xf32>
    %37 = vector.shape_cast %36 : vector<1x8x20xf32> to vector<8x20xf32>
    %c0_49 = arith.constant 0 : index
    %c1_50 = arith.constant 1 : index
    %38 = vector.load %arg6[%c0_49, %c1_50] : memref<20x964xf32, #tpu.memory_space<vmem>>, vector<20x960xf32>
    %cst_51 = arith.constant dense<0.000000e+00> : vector<8x960xf32>
    %39 = tpu.matmul %37, %38, %cst_51 {dimension_numbers = #tpu.dot_dimension_numbers<[1], [0], [0], [1], [0, 0, 1, 1], [], []>} : vector<8x20xf32>, vector<20x960xf32>, vector<8x960xf32> -> vector<8x960xf32>
    %40 = arith.addf %35, %39 : vector<8x960xf32>
    %c2 = arith.constant 2 : index
    %c0_52 = arith.constant 0 : index
    %c0_53 = arith.constant 0 : index
    %41 = vector.load %arg2[%c2, %c0_52, %c0_53] : memref<5x8x20xf32, #tpu.memory_space<vmem>>, vector<1x8x20xf32>
    %42 = vector.shape_cast %41 : vector<1x8x20xf32> to vector<8x20xf32>
    %c0_54 = arith.constant 0 : index
    %c2_55 = arith.constant 2 : index
    %43 = vector.load %arg6[%c0_54, %c2_55] : memref<20x964xf32, #tpu.memory_space<vmem>>, vector<20x960xf32>
    %cst_56 = arith.constant dense<0.000000e+00> : vector<8x960xf32>
    %44 = tpu.matmul %42, %43, %cst_56 {dimension_numbers = #tpu.dot_dimension_numbers<[1], [0], [0], [1], [0, 0, 1, 1], [], []>} : vector<8x20xf32>, vector<20x960xf32>, vector<8x960xf32> -> vector<8x960xf32>
    %45 = arith.addf %40, %44 : vector<8x960xf32>
    %c3 = arith.constant 3 : index
    %c0_57 = arith.constant 0 : index
    %c0_58 = arith.constant 0 : index
    %46 = vector.load %arg2[%c3, %c0_57, %c0_58] : memref<5x8x20xf32, #tpu.memory_space<vmem>>, vector<1x8x20xf32>
    %47 = vector.shape_cast %46 : vector<1x8x20xf32> to vector<8x20xf32>
    %c0_59 = arith.constant 0 : index
    %c3_60 = arith.constant 3 : index
    %48 = vector.load %arg6[%c0_59, %c3_60] : memref<20x964xf32, #tpu.memory_space<vmem>>, vector<20x960xf32>
    %cst_61 = arith.constant dense<0.000000e+00> : vector<8x960xf32>
    %49 = tpu.matmul %47, %48, %cst_61 {dimension_numbers = #tpu.dot_dimension_numbers<[1], [0], [0], [1], [0, 0, 1, 1], [], []>} : vector<8x20xf32>, vector<20x960xf32>, vector<8x960xf32> -> vector<8x960xf32>
    %50 = arith.addf %45, %49 : vector<8x960xf32>
    %c4_62 = arith.constant 4 : index
    %c0_63 = arith.constant 0 : index
    %c0_64 = arith.constant 0 : index
    %51 = vector.load %arg2[%c4_62, %c0_63, %c0_64] : memref<5x8x20xf32, #tpu.memory_space<vmem>>, vector<1x8x20xf32>
    %52 = vector.shape_cast %51 : vector<1x8x20xf32> to vector<8x20xf32>
    %c0_65 = arith.constant 0 : index
    %c4_66 = arith.constant 4 : index
    %53 = vector.load %arg6[%c0_65, %c4_66] : memref<20x964xf32, #tpu.memory_space<vmem>>, vector<20x960xf32>
    %cst_67 = arith.constant dense<0.000000e+00> : vector<8x960xf32>
    %54 = tpu.matmul %52, %53, %cst_67 {dimension_numbers = #tpu.dot_dimension_numbers<[1], [0], [0], [1], [0, 0, 1, 1], [], []>} : vector<8x20xf32>, vector<20x960xf32>, vector<8x960xf32> -> vector<8x960xf32>
    %55 = arith.addf %50, %54 : vector<8x960xf32>
    %c0_68 = arith.constant 0 : index
    %c0_69 = arith.constant 0 : index
    %56 = vector.load %arg3[%c0_68, %c0_69] : memref<8x1xf32, #tpu.memory_space<vmem>>, vector<8x1xf32>
    %57 = vector.broadcast %56 : vector<8x1xf32> to vector<8x960xf32>
    %58 = arith.addf %55, %57 : vector<8x960xf32>
    %59 = vector.extract_strided_slice %58 {offsets = [0, 0], sizes = [8, 480], strides = [1, 1]} : vector<8x960xf32> to vector<8x480xf32>
    %c0_70 = arith.constant 0 : index
    %c0_71 = arith.constant 0 : index
    %c0_72 = arith.constant 0 : index
    %60 = vector.load %arg4[%c0_70, %c0_71, %c0_72] : memref<2x8x480xf32, #tpu.memory_space<vmem>>, vector<1x8x480xf32>
    %61 = vector.shape_cast %60 : vector<1x8x480xf32> to vector<8x480xf32>
    %62 = arith.addf %59, %61 : vector<8x480xf32>
    %cst_73 = arith.constant 0.000000e+00 : f32
    %63 = vector.broadcast %cst_73 : f32 to vector<8x480xf32>
    %64 = arith.maximumf %62, %63 : vector<8x480xf32>
    %c0_74 = arith.constant 0 : index
    %c0_75 = arith.constant 0 : index
    %c0_76 = arith.constant 0 : index
    %65 = vector.load %arg5[%c0_74, %c0_75, %c0_76] : memref<2x8x480xf32, #tpu.memory_space<vmem>>, vector<1x8x480xf32>
    %66 = vector.shape_cast %65 : vector<1x8x480xf32> to vector<8x480xf32>
    %67 = vector.shape_cast %64 : vector<8x480xf32> to vector<1x8x480xf32>
    tpu.vector_store %arg5[%c0_74, %c0_75, %c0_76], %67 {strides = array<i32>} : memref<2x8x480xf32, #tpu.memory_space<vmem>>, vector<1x8x480xf32>,
    %68 = vector.extract_strided_slice %58 {offsets = [0, 480], sizes = [8, 480], strides = [1, 1]} : vector<8x960xf32> to vector<8x480xf32>
    %c1_77 = arith.constant 1 : index
    %c0_78 = arith.constant 0 : index
    %c0_79 = arith.constant 0 : index
    %69 = vector.load %arg4[%c1_77, %c0_78, %c0_79] : memref<2x8x480xf32, #tpu.memory_space<vmem>>, vector<1x8x480xf32>
    %70 = vector.shape_cast %69 : vector<1x8x480xf32> to vector<8x480xf32>
    %71 = arith.addf %68, %70 : vector<8x480xf32>
    %cst_80 = arith.constant 0.000000e+00 : f32
    %72 = vector.broadcast %cst_80 : f32 to vector<8x480xf32>
    %73 = arith.maximumf %71, %72 : vector<8x480xf32>
    %c1_81 = arith.constant 1 : index
    %c0_82 = arith.constant 0 : index
    %c0_83 = arith.constant 0 : index
    %74 = vector.load %arg5[%c1_81, %c0_82, %c0_83] : memref<2x8x480xf32, #tpu.memory_space<vmem>>, vector<1x8x480xf32>
    %75 = vector.shape_cast %74 : vector<1x8x480xf32> to vector<8x480xf32>
    %76 = vector.shape_cast %73 : vector<8x480xf32> to vector<1x8x480xf32>
    tpu.vector_store %arg5[%c1_81, %c0_82, %c0_83], %76 {strides = array<i32>} : memref<2x8x480xf32, #tpu.memory_space<vmem>>, vector<1x8x480xf32>,
    return
  }
  func.func @transform_0(%arg0: i32) -> (i32, i32, i32) {
    %c0_i32 = arith.constant 0 : i32
    %c0_i32_0 = arith.constant 0 : i32
    %c0_i32_1 = arith.constant 0 : i32
    return %arg0, %c0_i32, %c0_i32_0 : i32, i32, i32
  }
  func.func @transform_1(%arg0: i32) -> (i32, i32, i32) {
    %c0_i32 = arith.constant 0 : i32
    %c0_i32_0 = arith.constant 0 : i32
    %c0_i32_1 = arith.constant 0 : i32
    %c0_i32_2 = arith.constant 0 : i32
    return %c0_i32, %c0_i32_0, %c0_i32_1 : i32, i32, i32
  }
  func.func @transform_2(%arg0: i32) -> (i32, i32) {
    %c0_i32 = arith.constant 0 : i32
    %c0_i32_0 = arith.constant 0 : i32
    %c0_i32_1 = arith.constant 0 : i32
    return %c0_i32, %c0_i32_0 : i32, i32
  }
  func.func @transform_3(%arg0: i32) -> (i32, i32, i32) {
    %c0_i32 = arith.constant 0 : i32
    %c0_i32_0 = arith.constant 0 : i32
    %c0_i32_1 = arith.constant 0 : i32
    return %arg0, %c0_i32, %c0_i32_0 : i32, i32, i32
  }
  func.func @transform_4(%arg0: i32) -> (i32, i32, i32) {
    %c0_i32 = arith.constant 0 : i32
    %c0_i32_0 = arith.constant 0 : i32
    %c0_i32_1 = arith.constant 0 : i32
    return %arg0, %c0_i32, %c0_i32_0 : i32, i32, i32
  }
}

</mosaic_0001>

<bundles_post_ra>
// kernel: _deconv_block_impl.1
= control target key start
LH: loop header
LB: loop body
LE: loop exit
PB: predicated region body
PF: predicated region fallthrough
CT: control target
= control target key end

     0   :  { %s2448_s21 = smov 32   ;;  %vm33_vm0 = vcmask 781312   ;;  %s2449_s28 = smov 80   ;;  %vm20_vm1 = vcmask 552448   ;;  %v2454_v14 = vmov 0.0   ;;  %vm185_vm2 = vcmask 519168   ;;  %s3256_s0 = inlined_call_operand.vmem [shape: f32[2,4,576], index: 0, kind: input, shape index: {}]   ;;  %s3257_s1 = inlined_call_operand.vmem [shape: f32[5,8,20], index: 1, kind: input, shape index: {}]   ;;  %s3258_s2 = inlined_call_operand.vmem [shape: f32[8,1], index: 2, kind: input, shape index: {}]   ;;  %s3259_s3 = inlined_call_operand.vmem [shape: f32[2,8,480], index: 3, kind: input, shape index: {}]   ;;  %s3260_s4 = inlined_call_operand.vmem [shape: f32[2,8,480], index: 4, kind: output, shape index: {}]  }
   0x1   :  { %v127_v0 = vld [vmem:[%s3256_s0 + $0x10] sm:$0xf]  ;;  %v126_v1 = vld [vmem:[%s3256_s0 + $0x8] sm:$0xff]  ;;  %v125_v2 = vld [vmem:[%s3256_s0] sm:$0xff]  ;;  %s2450_s5 = smov 56   ;;  %s2451_s6 = smov 48   ;;  %520 = vmatprep.mubr.f32.mxu0 %v2454_v14  ;;  %591 = vmatprep.mubr.f32.mxu1 %v2454_v14 }
   0x2   :  { %141 = vrot.lane.b32.xlu0 %v127_v0, %s2448_s21  ;;  %137 = vrot.lane.b32.xlu1 %v126_v1, %s2448_s21  ;;  %v132_v3 = vcombine.high %v126_v1, %v126_v1  ;;  %v131_v4 = vcombine.high %v125_v2, %v125_v2  ;;  %32 = vst [vmem:[#allocation2 + $0x10] sm:$0xf] %v126_v1  ;;  %30 = vst [vmem:[#allocation2] sm:$0xf] %v125_v2  ;;  %v2501_v5 = vld [vmem:[%s3256_s0 + $0x14] sm:$0xff]  ;;  %v2506_v6 = vld [vmem:[%s3256_s0 + $0x1c] sm:$0xff] }
   0x3   :  { %v223_v7 = vcombine.high %v2501_v5, %v2501_v5  ;;  %v2512_v8 = vcombine.high %v2506_v6, %v2506_v6  ;;  %295 = vst [vmem:[#allocation2 + $0xa8] sm:$0xf] %v2506_v6  ;;  %v64_v9 = vld [vmem:[%s3256_s0 + $0x10] sm:$0xf]  ;;  %v100_v11 = vcombine.low %v126_v1, %v126_v1  ;;  %v256_v12 = vcombine.low %v2501_v5, %v2501_v5  ;;  %s2452_s7 = smov 24   ;;  %s2453_s8 = smov 104  }
   0x4   :  { %34 = vst.msk [vmem:[#allocation2 + $0x18] sm:$0xf] %vm33_vm0, %v132_v3  ;;  %31 = vst [vmem:[#allocation2 + $0x8] sm:$0xf] %v131_v4  ;;  %v2440_v10 = vld [vmem:[%s3256_s0 + $0x10] ss:$0 sps:$4 sm:$0xff]   ;;  %v99_v13 = vcombine.low %v125_v2, %v125_v2  ;;  %v257_v16 = vcombine.low %v2506_v6, %v2506_v6 }
   0x5   :  { %294 = vst [vmem:[#allocation2 + $0xa0] sm:$0xf] %v223_v7  ;;  %296 = vst [vmem:[#allocation2 + $0xb0] sm:$0xf] %v2512_v8  ;;  %v2349_v15 = vld [vmem:[%s3256_s0 + $0x24] sm:$0xf] }
   0x6   :  { %139 = vrot.lane.b32.xlu0 %v132_v3, %s2448_s21  ;;  %135 = vrot.lane.b32.xlu1 %v131_v4, %s2448_s21  ;;  %21 = vst.msk [vmem:[#allocation2 + $0xb8] sm:$0xf] %vm20_vm1, %v2454_v14  ;;  %s2455_s11 = smov 96   ;;  %vm17_vm3 = vcmask 556544   ;;  %s2456_s12 = smov 72   ;;  %vm143_vm4 = vcmask 261120  }
   0x7   :  { %297 = vst.msk [vmem:[#allocation2 + $0xb8] sm:$0xf] %vm185_vm2, %v2349_v15  ;;  %v2343_v17 = vld [vmem:[%s3256_s0 + $0x24] sm:$0xf]  ;;  %s2457_s17 = smov 127   ;;  %vm80_vm5 = vcmask 654336  }
   0x8   :  { %19 = vst.msk [vmem:[#allocation2 + $0x78] sm:$0xff] %vm17_vm3, %v2454_v14  ;;  %18 = vst.msk [vmem:[#allocation2 + $0x38] sm:$0xff] %vm17_vm3, %v2454_v14  ;;  %v2447_v18 = vld [vmem:[%s3256_s0 + $0x24] ss:$0 sps:$4 sm:$0xff]   ;;  %s2458_s0 = smov 126   ;;  %vm180_vm6 = vcmask 1044224  }
   0x9   :  { %vm112_vm7 = vcmask 457728   ;;  %vm60_vm8 = vcmask 785412   ;;  %vm235_vm9 = vcmask 392192   ;;  %vm210_vm10 = vcmask 1048324   ;;  %s2459_s18 = smov 125   ;;  %s2460_s19 = smov 124  }
   0xa   :  { %78 = vrot.lane.b32.xlu1 %v64_v9, %s2449_s28  ;;  %76 = vrot.lane.b32.xlu0 %v132_v3, %s2449_s28  ;;  %v2577_v21 = vld [vmem:[#allocation2 + $0xa8] sm:$0xf]  ;;  %vm269_vm11 = vcmask 195584   ;;  %vm49_vm12 = vcmask 850944   ;;  %vm171_vm13 = vcmask 785408   ;;  %vm201_vm14 = vcmask 588800  }
   0xb   :  { %vm215_vm15 = vcmask 523268   ;;  %vm397_vm1 = vcmask 1039360   ;;  %vm1093_vm3 = vcmask 1031168  }
   0xc   :  { %v2568_v19 = vld [vmem:[#allocation2 + $0xb0] sm:$0xf]  ;;  %v2573_v20 = vld [vmem:[#allocation2 + $0xa0] sm:$0xf] }
   0xe   :  { %110 = vrot.lane.b32.xlu1 %v2440_v10, %s2450_s5  ;;  %108 = vrot.lane.b32.xlu0 %v126_v1, %s2450_s5  ;;  %v2581_v22 = vld [vmem:[#allocation2 + $0xb8] sm:$0xf] }
  0x12   :  { %133 = vrot.lane.b32.xlu0 %v125_v2, %s2448_s21  ;;  %72 = vrot.lane.b32.xlu1 %v131_v4, %s2449_s28 }
  0x16   :  { %74 = vrot.lane.b32.xlu0 %v126_v1, %s2449_s28  ;;  %104 = vrot.lane.b32.xlu1 %v125_v2, %s2450_s5 }
  0x1a   :  { %106 = vrot.lane.b32.xlu0 %v100_v11, %s2450_s5  ;;  %225 = vrot.lane.b32.xlu1 %v2501_v5, %s2451_s6 }
  0x1e   :  { %227 = vrot.lane.b32.xlu0 %v223_v7, %s2451_s6  ;;  %259 = vrot.lane.b32.xlu1 %v256_v12, %s2452_s7 }
  0x22   :  { %261 = vrot.lane.b32.xlu0 %v2501_v5, %s2452_s7  ;;  %70 = vrot.lane.b32.xlu1 %v125_v2, %s2449_s28 }
  0x26   :  { %102 = vrot.lane.b32.xlu0 %v99_v13, %s2450_s5  ;;  %43 = vrot.lane.b32.xlu1 %v125_v2, %s2453_s8 }
  0x2a   :  { %45 = vrot.lane.b32.xlu0 %v100_v11, %s2453_s8  ;;  %47 = vrot.lane.b32.xlu1 %v126_v1, %s2453_s8 }
  0x2e   :  { %163 = vrot.lane.b32.xlu0 %v2501_v5, %s2455_s11  ;;  %165 = vrot.lane.b32.xlu1 %v223_v7, %s2455_s11 }
  0x32   :  { %193 = vrot.lane.b32.xlu0 %v256_v12, %s2456_s12  ;;  %195 = vrot.lane.b32.xlu1 %v2501_v5, %s2456_s12 }
  0x36   :  { %229 = vrot.lane.b32.xlu1 %v2506_v6, %s2451_s6  ;;  %41 = vrot.lane.b32.xlu0 %v99_v13, %s2453_s8 }
  0x3a   :  { %263 = vrot.lane.b32.xlu1 %v257_v16, %s2452_s7  ;;  %231 = vrot.lane.b32.xlu0 %v2512_v8, %s2451_s6 }
  0x3e   :  { %233 = vrot.lane.b32.xlu1 %v2343_v17, %s2451_s6  ;;  %265 = vrot.lane.b32.xlu0 %v2506_v6, %s2452_s7 }
  0x42   :  { %167 = vrot.lane.b32.xlu1 %v2506_v6, %s2455_s11  ;;  %267 = vrot.lane.b32.xlu0 %v2447_v18, %s2452_s7 }
  0x46   :  { %197 = vrot.lane.b32.xlu1 %v257_v16, %s2456_s12  ;;  %169 = vrot.lane.b32.xlu0 %v2512_v8, %s2455_s11 }
  0x4a   :  { %199 = vrot.lane.b32.xlu0 %v2506_v6, %s2456_s12  ;;  %393 = vrot.lane.b32.xlu1 %v2568_v19, %s2457_s17 }
  0x4e   :  { %389 = vrot.lane.b32.xlu0 %v2573_v20, %s2457_s17 }
  0x52   :  { %391 = vrot.lane.b32.xlu0 %v2577_v21, %s2457_s17 }
  0x56   :  { %395 = vrot.lane.b32.xlu0 %v2581_v22, %s2457_s17 }
  0x5a   :  { %1085 = vrot.lane.b32.xlu0 %v2573_v20, %s2458_s0 }
  0x74   :  { %v142_v23 = vpop.permute.xlu0 %141  ;;  %v138_v24 = vpop.permute.xlu1 %137 }
  0x78   :  { %v140_v25 = vpop.permute.xlu0 %139  ;;  %v136_v26 = vpop.permute.xlu1 %135 }
  0x79   :  { %v146_v27 = vsel %vm143_vm4, %v138_v24, %v140_v25  ;;  %v147_v28 = vsel %vm143_vm4, %v140_v25, %v142_v23  ;;  %v145_v29 = vsel %vm143_vm4, %v136_v26, %v138_v24 }
  0x7a   :  { %154 = vst [vmem:[#allocation2 + $0x90] sm:$0xf] %v146_v27  ;;  %155 = vst.msk [vmem:[#allocation2 + $0x98] sm:$0xf] %vm33_vm0, %v147_v28 }
  0x7b   :  { %153 = vst [vmem:[#allocation2 + $0x88] sm:$0xf] %v145_v29  ;;  %293 = vst.msk [vmem:[#allocation2 + $0x98] sm:$0xf] %vm180_vm6, %v2501_v5 }
  0x7c   :  { %v79_v30 = vpop.permute.xlu1 %78  ;;  %v77_v31 = vpop.permute.xlu0 %76 }
  0x7d   :  { %v84_v32 = vsel %vm80_vm5, %v77_v31, %v79_v30 }
  0x7e   :  { %92 = vst.msk [vmem:[#allocation2 + $0x58] sm:$0xf] %vm33_vm0, %v84_v32  ;;  %vm439_vm0 = vcmask 1043456  }
  0x80   :  { %v111_v33 = vpop.permute.xlu1 %110  ;;  %v109_v34 = vpop.permute.xlu0 %108 }
  0x81   :  { %v116_v35 = vsel %vm112_vm7, %v109_v34, %v111_v33 }
  0x82   :  { %124 = vst.msk [vmem:[#allocation2 + $0x58] sm:$0xf0] %vm60_vm8, %v116_v35  ;;  %v2623_v15 = vld [vmem:[#allocation2 + $0x88] sm:$0xf] }
  0x84   :  { %v134_v36 = vpop.permute.xlu0 %133  ;;  %v73_v37 = vpop.permute.xlu1 %72 }
  0x85   :  { %v144_v38 = vsel %vm143_vm4, %v134_v36, %v136_v26 }
  0x86   :  { %152 = vst [vmem:[#allocation2 + $0x80] sm:$0xf] %v144_v38  ;;  %v2662_v38 = vld [vmem:[#allocation2 + $0x90] sm:$0xf] }
  0x88   :  { %v75_v39 = vpop.permute.xlu0 %74  ;;  %v105_v40 = vpop.permute.xlu1 %104 }
  0x89   :  { %v82_v41 = vsel %vm80_vm5, %v73_v37, %v75_v39  ;;  %v83_v42 = vsel %vm80_vm5, %v75_v39, %v77_v31 }
  0x8a   :  { %90 = vst [vmem:[#allocation2 + $0x48] sm:$0xf] %v82_v41  ;;  %91 = vst [vmem:[#allocation2 + $0x50] sm:$0xf] %v83_v42 }
  0x8c   :  { %v107_v43 = vpop.permute.xlu0 %106  ;;  %v226_v44 = vpop.permute.xlu1 %225 }
  0x8d   :  { %v114_v45 = vsel %vm112_vm7, %v105_v40, %v107_v43  ;;  %v115_v46 = vsel %vm112_vm7, %v107_v43, %v109_v34  ;;  %245 = vst.msk [vmem:[#allocation2 + $0x58] sm:$0xf] %vm180_vm6, %v226_v44  ;;  %v2630_v24 = vld [vmem:[#allocation2 + $0x80] sm:$0xf] }
  0x8e   :  { %122 = vst [vmem:[#allocation2 + $0x48] sm:$0xf0] %v114_v45  ;;  %123 = vst [vmem:[#allocation2 + $0x50] sm:$0xf0] %v115_v46  ;;  %v2698_v46 = vld [vmem:[#allocation2 + $0x98] sm:$0xf] }
  0x90   :  { %v228_v47 = vpop.permute.xlu0 %227  ;;  %v260_v48 = vpop.permute.xlu1 %259 }
  0x91   :  { %v236_v49 = vsel %vm235_vm9, %v226_v44, %v228_v47  ;;  %279 = vst.msk [vmem:[#allocation2 + $0x58] sm:$0xf0] %vm210_vm10, %v260_v48 }
  0x92   :  { %246 = vst [vmem:[#allocation2 + $0x60] sm:$0xf] %v236_v49 }
  0x94   :  { %v262_v50 = vpop.permute.xlu0 %261  ;;  %v71_v51 = vpop.permute.xlu1 %70 }
  0x95   :  { %v270_v52 = vsel %vm269_vm11, %v260_v48, %v262_v50  ;;  %v81_v53 = vsel %vm80_vm5, %v71_v51, %v73_v37  ;;  %v2637_v29 = vld [vmem:[#allocation2 + $0x50] sm:$0xff]  ;;  %vm1492_vm5 = vcmask 1022976  }
  0x96   :  { %280 = vst [vmem:[#allocation2 + $0x60] sm:$0xf0] %v270_v52  ;;  %89 = vst [vmem:[#allocation2 + $0x40] sm:$0xf] %v81_v53 }
  0x98   :  { %v103_v54 = vpop.permute.xlu0 %102  ;;  %v44_v55 = vpop.permute.xlu1 %43  ;;  %v2716_v49 = vld [vmem:[#allocation2 + $0x58] sm:$0xff] }
  0x99   :  { %v113_v56 = vsel %vm112_vm7, %v103_v54, %v105_v40  ;;  %v2670_v40 = vld [vmem:[#allocation2 + $0x48] sm:$0xff] }
  0x9a   :  { %121 = vst [vmem:[#allocation2 + $0x40] sm:$0xf0] %v113_v56 }
  0x9c   :  { %v46_v57 = vpop.permute.xlu0 %45  ;;  %v48_v58 = vpop.permute.xlu1 %47 }
  0x9d   :  { %v51_v59 = vsel %vm49_vm12, %v44_v55, %v46_v57  ;;  %v52_v60 = vsel %vm49_vm12, %v46_v57, %v48_v58  ;;  %61 = vst.msk [vmem:[#allocation2 + $0x18] sm:$0xf0] %vm60_vm8, %v48_v58  ;;  %v2644_v33 = vld [vmem:[#allocation2 + $0x60] sm:$0xff] }
  0x9e   :  { %58 = vst [vmem:[#allocation2 + $0x8] sm:$0xf0] %v51_v59  ;;  %59 = vst [vmem:[#allocation2 + $0x10] sm:$0xf0] %v52_v60 }
  0xa0   :  { %v164_v61 = vpop.permute.xlu0 %163  ;;  %v166_v62 = vpop.permute.xlu1 %165 }
  0xa1   :  { %181 = vst.msk [vmem:[#allocation2 + $0x18] sm:$0xf] %vm180_vm6, %v164_v61  ;;  %v172_v63 = vsel %vm171_vm13, %v164_v61, %v166_v62  ;;  %v2678_v42 = vld [vmem:[#allocation2 + $0x40] sm:$0xff]  ;;  %vm1891_vm6 = vcmask 1014784  }
  0xa2   :  { %182 = vst [vmem:[#allocation2 + $0x20] sm:$0xf] %v172_v63 }
  0xa4   :  { %v194_v0 = vpop.permute.xlu0 %193  ;;  %v196_v1 = vpop.permute.xlu1 %195 }
  0xa5   :  { %211 = vst.msk [vmem:[#allocation2 + $0x18] sm:$0xf0] %vm210_vm10, %v194_v0  ;;  %v202_v2 = vsel %vm201_vm14, %v194_v0, %v196_v1  ;;  %v2650_v35 = vld [vmem:[#allocation2 + $0x8] sm:$0xff]  ;;  %v2686_v44 = vld [vmem:[#allocation2 + $0x10] sm:$0xff] }
  0xa6   :  { %212 = vst [vmem:[#allocation2 + $0x20] sm:$0xf0] %v202_v2 }
  0xa8   :  { %v230_v3 = vpop.permute.xlu1 %229  ;;  %v42_v4 = vpop.permute.xlu0 %41 }
  0xa9   :  { %v237_v5 = vsel %vm235_vm9, %v228_v47, %v230_v3  ;;  %v50_v6 = vsel %vm49_vm12, %v42_v4, %v44_v55 }
  0xaa   :  { %247 = vst [vmem:[#allocation2 + $0x68] sm:$0xf] %v237_v5  ;;  %57 = vst [vmem:[#allocation2] sm:$0xf0] %v50_v6 }
  0xac   :  { %v264_v7 = vpop.permute.xlu1 %263  ;;  %v232_v8 = vpop.permute.xlu0 %231  ;;  %v2617_v9 = vld [vmem:[#allocation2 + $0x18] sm:$0xff] }
  0xad   :  { %v271_v10 = vsel %vm269_vm11, %v262_v50, %v264_v7  ;;  %v238_v11 = vsel %vm235_vm9, %v230_v3, %v232_v8  ;;  %355 = vrot.lane.b32.xlu1 %v2617_v9, %s2457_s17  ;;  %v2692_v45 = vld [vmem:[#allocation2 + $0x20] sm:$0xff] }
  0xae   :  { %281 = vst [vmem:[#allocation2 + $0x68] sm:$0xf0] %v271_v10  ;;  %248 = vst [vmem:[#allocation2 + $0x70] sm:$0xf] %v238_v11 }
  0xb0   :  { %v234_v12 = vpop.permute.xlu1 %233  ;;  %v266_v13 = vpop.permute.xlu0 %265 }
  0xb1   :  { %v239_v16 = vsel %vm235_vm9, %v232_v8, %v234_v12  ;;  %v272_v17 = vsel %vm269_vm11, %v264_v7, %v266_v13  ;;  %383 = vrot.lane.b32.xlu1 %v2623_v15, %s2457_s17  ;;  %v2656_v37 = vld [vmem:[#allocation2] sm:$0xff] }
  0xb2   :  { %249 = vst.msk [vmem:[#allocation2 + $0x78] sm:$0xf] %vm185_vm2, %v239_v16  ;;  %282 = vst [vmem:[#allocation2 + $0x70] sm:$0xf0] %v272_v17 }
  0xb4   :  { %v168_v18 = vpop.permute.xlu1 %167  ;;  %v268_v23 = vpop.permute.xlu0 %267 }
  0xb5   :  { %v173_v25 = vsel %vm171_vm13, %v166_v62, %v168_v18  ;;  %v273_v26 = vsel %vm269_vm11, %v266_v13, %v268_v23  ;;  %381 = vrot.lane.b32.xlu1 %v2630_v24, %s2457_s17  ;;  %v2664_v39 = vld [vmem:[#allocation2 + $0x68] sm:$0xff] }
  0xb6   :  { %183 = vst [vmem:[#allocation2 + $0x28] sm:$0xf] %v173_v25  ;;  %283 = vst.msk [vmem:[#allocation2 + $0x78] sm:$0xf0] %vm215_vm15, %v273_v26  ;;  %v2850_v13 = vld [vmem:[%s3257_s1 + $0x8] sm:$0xff] }
  0xb8   :  { %v198_v27 = vpop.permute.xlu1 %197  ;;  %v170_v28 = vpop.permute.xlu0 %169 }
  0xb9   :  { %v203_v30 = vsel %vm201_vm14, %v196_v1, %v198_v27  ;;  %v174_v31 = vsel %vm171_vm13, %v168_v18, %v170_v28  ;;  %186 = vst.msk [vmem:[#allocation2 + $0x38] sm:$0xf] %vm185_vm2, %v170_v28  ;;  %369 = vrot.lane.b32.xlu1 %v2637_v29, %s2457_s17  ;;  %v2700_v47 = vld [vmem:[#allocation2 + $0x70] sm:$0xff]  ;;  %vm435_vm2 = vcmask 162816  }
  0xba   :  { %213 = vst [vmem:[#allocation2 + $0x28] sm:$0xf0] %v203_v30  ;;  %184 = vst [vmem:[#allocation2 + $0x30] sm:$0xf] %v174_v31 }
  0xbc   :  { %v200_v32 = vpop.permute.xlu0 %199  ;;  %v2770_v50 = vpop.permute.xlu1 %393 }
  0xbd   :  { %v204_v34 = vsel %vm201_vm14, %v198_v27, %v200_v32  ;;  %216 = vst.msk [vmem:[#allocation2 + $0x38] sm:$0xf0] %vm215_vm15, %v200_v32  ;;  %373 = vrot.lane.b32.xlu1 %v2644_v33, %s2457_s17  ;;  %v2672_v41 = vld [vmem:[#allocation2 + $0x78] sm:$0xff] }
  0xbe   :  { %214 = vst [vmem:[#allocation2 + $0x30] sm:$0xf0] %v204_v34 }
  0xc0   :  { %v2778_v52 = vpop.permute.xlu0 %389 }
  0xc1   :  { %351 = vrot.lane.b32.xlu1 %v2650_v35, %s2457_s17  ;;  %v2706_v48 = vld [vmem:[#allocation2 + $0x28] sm:$0xff] }
  0xc4   :  { %v2654_v36 = vld [vmem:[#allocation2 + $0x38] sm:$0xff]  ;;  %v392_v54 = vpop.permute.xlu0 %391 }
  0xc5   :  { %363 = vrot.lane.b32.xlu0 %v2654_v36, %s2457_s17  ;;  %349 = vrot.lane.b32.xlu1 %v2656_v37, %s2457_s17  ;;  %v2680_v43 = vld [vmem:[#allocation2 + $0x30] sm:$0xff]  ;;  %v417_v17 = vsel %vm397_vm1, %v392_v54, %v2770_v50  ;;  %v416_v18 = vsel %vm397_vm1, %v2778_v52, %v392_v54 }
  0xc8   :  { %v2794_v57 = vpop.permute.xlu0 %395 }
  0xc9   :  { %385 = vrot.lane.b32.xlu0 %v2662_v38, %s2457_s17  ;;  %375 = vrot.lane.b32.xlu1 %v2664_v39, %s2457_s17 }
  0xcc   :  { %v2806_v59 = vpop.permute.xlu0 %1085 }
  0xcd   :  { %367 = vrot.lane.b32.xlu0 %v2670_v40, %s2457_s17  ;;  %379 = vrot.lane.b32.xlu1 %v2672_v41, %s2457_s17 }
  0xd1   :  { %365 = vrot.lane.b32.xlu0 %v2678_v42, %s2457_s17  ;;  %361 = vrot.lane.b32.xlu1 %v2680_v43, %s2457_s17 }
  0xd5   :  { %353 = vrot.lane.b32.xlu0 %v2686_v44, %s2457_s17  ;;  %1079 = vrot.lane.b32.xlu1 %v2623_v15, %s2458_s0 }
  0xd9   :  { %357 = vrot.lane.b32.xlu0 %v2692_v45, %s2457_s17  ;;  %1077 = vrot.lane.b32.xlu1 %v2630_v24, %s2458_s0 }
  0xdd   :  { %377 = vrot.lane.b32.xlu0 %v2700_v47, %s2457_s17  ;;  %387 = vrot.lane.b32.xlu1 %v2698_v46, %s2457_s17 }
  0xe1   :  { %359 = vrot.lane.b32.xlu0 %v2706_v48, %s2457_s17  ;;  %1083 = vrot.lane.b32.xlu1 %v2698_v46, %s2458_s0 }
  0xe5   :  { %1081 = vrot.lane.b32.xlu0 %v2662_v38, %s2458_s0  ;;  %1065 = vrot.lane.b32.xlu1 %v2637_v29, %s2458_s0 }
  0xe9   :  { %371 = vrot.lane.b32.xlu0 %v2716_v49, %s2457_s17  ;;  %1069 = vrot.lane.b32.xlu1 %v2644_v33, %s2458_s0 }
  0xed   :  { %1063 = vrot.lane.b32.xlu0 %v2670_v40, %s2458_s0  ;;  %1047 = vrot.lane.b32.xlu1 %v2650_v35, %s2458_s0 }
  0xf1   :  { %1067 = vrot.lane.b32.xlu0 %v2716_v49, %s2458_s0  ;;  %1051 = vrot.lane.b32.xlu1 %v2617_v9, %s2458_s0 }
  0xf5   :  { %1061 = vrot.lane.b32.xlu0 %v2678_v42, %s2458_s0  ;;  %1045 = vrot.lane.b32.xlu1 %v2656_v37, %s2458_s0 }
  0xf9   :  { %1049 = vrot.lane.b32.xlu0 %v2686_v44, %s2458_s0  ;;  %1089 = vrot.lane.b32.xlu1 %v2568_v19, %s2458_s0 }
  0xfd   :  { %1053 = vrot.lane.b32.xlu0 %v2692_v45, %s2458_s0  ;;  %1071 = vrot.lane.b32.xlu1 %v2664_v39, %s2458_s0 }
 0x101   :  { %1087 = vrot.lane.b32.xlu0 %v2577_v21, %s2458_s0  ;;  %1075 = vrot.lane.b32.xlu1 %v2672_v41, %s2458_s0 }
 0x105   :  { %1091 = vrot.lane.b32.xlu0 %v2581_v22, %s2458_s0  ;;  %1057 = vrot.lane.b32.xlu1 %v2680_v43, %s2458_s0 }
 0x109   :  { %1073 = vrot.lane.b32.xlu0 %v2700_v47, %s2458_s0  ;;  %1478 = vrot.lane.b32.xlu1 %v2623_v15, %s2459_s18 }
 0x10d   :  { %1055 = vrot.lane.b32.xlu0 %v2706_v48, %s2458_s0  ;;  %1482 = vrot.lane.b32.xlu1 %v2698_v46, %s2459_s18 }
 0x111   :  { %1059 = vrot.lane.b32.xlu0 %v2654_v36, %s2458_s0  ;;  %1476 = vrot.lane.b32.xlu1 %v2630_v24, %s2459_s18 }
 0x115   :  { %1480 = vrot.lane.b32.xlu0 %v2662_v38, %s2459_s18  ;;  %1464 = vrot.lane.b32.xlu1 %v2637_v29, %s2459_s18 }
 0x119   :  { %1484 = vrot.lane.b32.xlu0 %v2573_v20, %s2459_s18  ;;  %1468 = vrot.lane.b32.xlu1 %v2644_v33, %s2459_s18 }
 0x11d   :  { %1462 = vrot.lane.b32.xlu0 %v2670_v40, %s2459_s18  ;;  %1446 = vrot.lane.b32.xlu1 %v2650_v35, %s2459_s18 }
 0x11f   :  { %v2776_v51 = vpop.permute.xlu1 %355 }
 0x121   :  { %1466 = vrot.lane.b32.xlu0 %v2716_v49, %s2459_s18  ;;  %1450 = vrot.lane.b32.xlu1 %v2617_v9, %s2459_s18 }
 0x123   :  { %v384_v53 = vpop.permute.xlu1 %383 }
 0x125   :  { %1460 = vrot.lane.b32.xlu0 %v2678_v42, %s2459_s18  ;;  %1444 = vrot.lane.b32.xlu1 %v2656_v37, %s2459_s18 }
 0x127   :  { %v382_v55 = vpop.permute.xlu1 %381 }
 0x128   :  { %v412_v2 = vsel %vm397_vm1, %v382_v55, %v384_v53 }
 0x129   :  { %1448 = vrot.lane.b32.xlu0 %v2686_v44, %s2459_s18  ;;  %1488 = vrot.lane.b32.xlu1 %v2568_v19, %s2459_s18 }
 0x12b   :  { %v2792_v56 = vpop.permute.xlu1 %369 }
 0x12d   :  { %1452 = vrot.lane.b32.xlu0 %v2692_v45, %s2459_s18  ;;  %1470 = vrot.lane.b32.xlu1 %v2664_v39, %s2459_s18 }
 0x12f   :  { %v2800_v58 = vpop.permute.xlu1 %373 }
 0x131   :  { %1486 = vrot.lane.b32.xlu0 %v2577_v21, %s2459_s18  ;;  %1474 = vrot.lane.b32.xlu1 %v2672_v41, %s2459_s18 }
 0x133   :  { %v352_v60 = vpop.permute.xlu1 %351 }
 0x135   :  { %1490 = vrot.lane.b32.xlu0 %v2581_v22, %s2459_s18  ;;  %1456 = vrot.lane.b32.xlu1 %v2680_v43, %s2459_s18 }
 0x137   :  { %v2812_v61 = vpop.permute.xlu0 %363  ;;  %v350_v62 = vpop.permute.xlu1 %349 }
 0x138   :  { %v398_v16 = vsel %vm397_vm1, %v350_v62, %v352_v60 }
 0x139   :  { %1472 = vrot.lane.b32.xlu0 %v2700_v47, %s2459_s18  ;;  %1877 = vrot.lane.b32.xlu1 %v2623_v15, %s2460_s19 }
 0x13b   :  { %v386_v63 = vpop.permute.xlu0 %385  ;;  %v376_v0 = vpop.permute.xlu1 %375 }
 0x13c   :  { %v413_v1 = vsel %vm397_vm1, %v384_v53, %v386_v63  ;;  %v409_v32 = vsel %vm397_vm1, %v2800_v58, %v376_v0 }
 0x13d   :  { %1454 = vrot.lane.b32.xlu0 %v2706_v48, %s2459_s18  ;;  %2351 = vmatprep.subr.msk.mxu0 %vm439_vm0, %v413_v1 }
 0x13e   :  { %1881 = vrot.lane.b32.xlu1 %v2698_v46, %s2460_s19  ;;  %2352 = vmatpush1.msk.msra.mxu0 %vm439_vm0, %v412_v2 }
 0x13f   :  { %v368_v3 = vpop.permute.xlu0 %367  ;;  %v2826_v4 = vpop.permute.xlu1 %379 }
 0x140   :  { %v406_v5 = vsel %vm397_vm1, %v368_v3, %v2792_v56 }
 0x141   :  { %1458 = vrot.lane.b32.xlu0 %v2654_v36, %s2459_s18  ;;  %484 = vmatprep.subr.mxu0 %v406_v5 }
 0x142   :  { %1875 = vrot.lane.b32.xlu1 %v2630_v24, %s2460_s19 }
 0x143   :  { %v366_v6 = vpop.permute.xlu0 %365  ;;  %v2834_v7 = vpop.permute.xlu1 %361 }
 0x144   :  { %v405_v8 = vsel %vm397_vm1, %v366_v6, %v368_v3 }
 0x145   :  { %1879 = vrot.lane.b32.xlu0 %v2662_v38, %s2460_s19  ;;  %485 = vmatpush1.msra.mxu0 %v405_v8 }
 0x146   :  { %1863 = vrot.lane.b32.xlu1 %v2637_v29, %s2460_s19 }
 0x147   :  { %v2841_v10 = vpop.permute.xlu0 %353  ;;  %v2843_v11 = vpop.permute.xlu1 %1079 }
 0x148   :  { %v399_v12 = vsel %vm397_vm1, %v352_v60, %v2841_v10 }
 0x149   :  { %1883 = vrot.lane.b32.xlu0 %v2573_v20, %s2460_s19  ;;  %486 = vmatprep.subr.mxu0 %v399_v12 }
 0x14a   :  { %1867 = vrot.lane.b32.xlu1 %v2644_v33, %s2460_s19  ;;  %487 = vmatpush1.msra.mxu0 %v398_v16 }
 0x14b   :  { %v358_v23 = vpop.permute.xlu0 %357  ;;  %2357 = vmatprep.subr.msk.mxu0 %vm439_vm0, %v417_v17  ;;  %v2862_v25 = vpop.permute.xlu1 %1077  ;;  %2353 = vmatmul.mubr.msk.f32.vlgmr.msra.gmra.mxu0 %vm435_vm2, %v2850_v13 }
 0x14c   :  { %2358 = vmatpush1.msk.msra.mxu0 %vm439_vm0, %v416_v18  ;;  %662 = vmatprep.mubr.f32.mxu0 %v2454_v14 }
 0x14d   :  { %1861 = vrot.lane.b32.xlu0 %v2670_v40, %s2460_s19 }
 0x14e   :  { %1845 = vrot.lane.b32.xlu1 %v2650_v35, %s2460_s19 }
 0x14f   :  { %v2872_v26 = vpop.permute.xlu0 %377  ;;  %v388_v27 = vpop.permute.xlu1 %387 }
 0x150   :  { %v415_v28 = vsel %vm397_vm1, %v388_v27, %v2778_v52  ;;  %v410_v30 = vsel %vm397_vm1, %v376_v0, %v2872_v26  ;;  %v414_v31 = vsel %vm397_vm1, %v386_v63, %v388_v27  ;;  %v404_v0 = vsel %vm397_vm1, %v2834_v7, %v2812_v61 }
 0x151   :  { %1865 = vrot.lane.b32.xlu0 %v2716_v49, %s2460_s19  ;;  %2354 = vmatprep.subr.msk.mxu1 %vm439_vm0, %v415_v28 }
 0x152   :  { %1849 = vrot.lane.b32.xlu1 %v2617_v9, %s2460_s19  ;;  %626 = vmatprep.subr.mxu0 %v410_v30 }
 0x153   :  { %2355 = vmatpush1.msk.msra.mxu1 %vm439_vm0, %v414_v31  ;;  %627 = vmatpush1.msra.mxu0 %v409_v32  ;;  %v360_v34 = vpop.permute.xlu0 %359  ;;  %v2887_v52 = vpop.permute.xlu1 %1083  ;;  %v2415_v31 = vld [vmem:[%s3259_s3 + $0x28] sm:$0xff]  ;;  %v2416_v32 = vld [vmem:[%s3259_s3 + $0x30] sm:$0xff] }
 0x154   :  { %v402_v53 = vsel %vm397_vm1, %v358_v23, %v360_v34  ;;  %v403_v54 = vsel %vm397_vm1, %v360_v34, %v2834_v7 }
 0x155   :  { %1859 = vrot.lane.b32.xlu0 %v2678_v42, %s2460_s19  ;;  %628 = vmatprep.subr.mxu0 %v403_v54  ;;  %v2417_v54 = vld [vmem:[%s3259_s3 + $0x38] sm:$0xff] }
 0x156   :  { %1843 = vrot.lane.b32.xlu1 %v2656_v37, %s2460_s19  ;;  %629 = vmatpush1.msra.mxu0 %v402_v53 }
 0x157   :  { %v2896_v55 = vpop.permute.xlu0 %1081  ;;  %2363 = vmatprep.subr.msk.mxu0 %vm439_vm0, %v2623_v15  ;;  %v2900_v60 = vpop.permute.xlu1 %1065  ;;  %2359 = vmatmul.mubr.msk.f32.vlgmr.msra.gmra.mxu0 %vm435_vm2, %v2850_v13 }
 0x158   :  { %2364 = vmatpush1.msk.msra.mxu0 %vm439_vm0, %v2630_v24  ;;  %823 = vmatprep.mubr.f32.mxu0 %v2454_v14 }
 0x159   :  { %1847 = vrot.lane.b32.xlu0 %v2686_v44, %s2460_s19  ;;  %787 = vmatprep.subr.mxu0 %v2670_v40  ;;  %v2924_v40 = vld [vmem:[%s3257_s1] sm:$0xff] }
 0x15a   :  { %1887 = vrot.lane.b32.xlu1 %v2568_v19, %s2460_s19  ;;  %788 = vmatpush1.msra.mxu0 %v2678_v42 }
 0x15b   :  { %v372_v15 = vpop.permute.xlu0 %371  ;;  %789 = vmatprep.subr.mxu0 %v2650_v35  ;;  %v2914_v62 = vpop.permute.xlu1 %1069 }
 0x15c   :  { %790 = vmatpush1.msra.mxu0 %v2656_v37  ;;  %v408_v24 = vsel %vm397_vm1, %v372_v15, %v2800_v58  ;;  %v407_v63 = vsel %vm397_vm1, %v2792_v56, %v372_v15  ;;  %v401_v37 = vsel %vm397_vm1, %v2776_v51, %v358_v23  ;;  %v400_v56 = vsel %vm397_vm1, %v2841_v10, %v2776_v51  ;;  %v2240_v23 = vld [vmem:[%s3258_s2] sm:$0xff] }
 0x15d   :  { %1851 = vrot.lane.b32.xlu0 %v2692_v45, %s2460_s19  ;;  %555 = vmatprep.subr.mxu1 %v408_v24 }
 0x15e   :  { %1869 = vrot.lane.b32.xlu1 %v2664_v39, %s2460_s19  ;;  %2369 = vmatprep.subr.msk.mxu0 %vm439_vm0, %v2577_v21 }
 0x15f   :  { %556 = vmatpush1.msra.mxu1 %v407_v63  ;;  %2365 = vmatmul.mubr.msk.f32.vlgmr.msra.gmra.mxu0 %vm435_vm2, %v2924_v40  ;;  %v1064_v35 = vpop.permute.xlu0 %1063  ;;  %v1048_v42 = vpop.permute.xlu1 %1047 }
 0x160   :  { %2370 = vmatpush1.msk.msra.mxu0 %vm439_vm0, %v2573_v20  ;;  %557 = vmatprep.subr.mxu1 %v401_v37 }
 0x161   :  { %929 = vmatprep.subr.mxu0 %v2664_v39  ;;  %558 = vmatpush1.msra.mxu1 %v400_v56  ;;  %v418_v39 = vsel %vm397_vm1, %v2770_v50, %v2794_v57 }
 0x162   :  { %930 = vmatpush1.msra.mxu0 %v2644_v33  ;;  %1885 = vrot.lane.b32.xlu0 %v2577_v21, %s2460_s19  ;;  %v411_v21 = vsel %vm397_vm1, %v2872_v26, %v2826_v4  ;;  %v1109_v33 = vsel %vm1093_vm3, %v2843_v11, %v2896_v55  ;;  %v2414_v26 = vld [vmem:[%s3259_s3 + $0x20] sm:$0xff] }
 0x163   :  { %1873 = vrot.lane.b32.xlu1 %v2672_v41, %s2460_s19  ;;  %2360 = vmatprep.subr.msk.mxu1 %vm439_vm0, %v2794_v57  ;;  %v2949_v20 = vpop.permute.xlu0 %1067  ;;  %v2951_v58 = vpop.permute.xlu1 %1051  ;;  %v1102_v57 = vsel %vm1093_vm3, %v1064_v35, %v2900_v60 }
 0x164   :  { %931 = vmatprep.subr.mxu0 %v2706_v48  ;;  %2356 = vmatmul.mubr.msk.f32.vlgmr.msra.gmra.mxu1 %vm435_vm2, %v2850_v13 }
 0x165   :  { %2361 = vmatpush1.msk.msra.mxu1 %vm439_vm0, %v418_v39  ;;  %932 = vmatpush1.msra.mxu0 %v2692_v45  ;;  %v1108_v45 = vsel %vm1093_vm3, %v2862_v25, %v2843_v11  ;;  %v2461_v25 = vmov 0  }
 0x166   :  { %697 = vmatprep.subr.mxu1 %v2826_v4  ;;  %965 = vmatprep.mubr.f32.mxu0 %v2454_v14 }
 0x167   :  { %2376 = vmatprep.subr.msk.mxu0 %vm439_vm0, %v1109_v33  ;;  %698 = vmatpush1.msra.mxu1 %v411_v21  ;;  %v1062_v50 = vpop.permute.xlu0 %1061  ;;  %v1046_v51 = vpop.permute.xlu1 %1045 }
 0x168   :  { %2371 = vmatmul.mubr.msk.f32.vlgmr.msra.gmra.mxu0 %vm435_vm2, %v2924_v40  ;;  %1889 = vrot.lane.b32.xlu0 %v2581_v22, %s2460_s19  ;;  %v1101_v1 = vsel %vm1093_vm3, %v1062_v50, %v1064_v35 }
 0x169   :  { %2377 = vmatpush1.msk.msra.mxu0 %vm439_vm0, %v1108_v45  ;;  %1855 = vrot.lane.b32.xlu1 %v2680_v43, %s2460_s19  ;;  %v2388_v45 = vld [vmem:[%s3257_s1 + $0x18] sm:$0xff] }
 0x16a   :  { %699 = vmatprep.subr.mxu1 %v2812_v61  ;;  %1178 = vmatprep.subr.mxu0 %v1102_v57 }
 0x16b   :  { %700 = vmatpush1.msra.mxu1 %v404_v0  ;;  %733 = vmatprep.mubr.f32.mxu1 %v2454_v14  ;;  %v1050_v2 = vpop.permute.xlu0 %1049  ;;  %v1090_v3 = vpop.permute.xlu1 %1089 }
 0x16c   :  { %2366 = vmatprep.subr.msk.mxu1 %vm439_vm0, %v2698_v46  ;;  %2362 = vmatmul.mubr.msk.f32.vlgmr.msra.gmra.mxu1 %vm435_vm2, %v2850_v13  ;;  %v1095_v61 = vsel %vm1093_vm3, %v1048_v42, %v1050_v2  ;;  %v1096_v7 = vsel %vm1093_vm3, %v1050_v2, %v2951_v58 }
 0x16d   :  { %2367 = vmatpush1.msk.msra.mxu1 %vm439_vm0, %v2662_v38  ;;  %1871 = vrot.lane.b32.xlu0 %v2700_v47, %s2460_s19  ;;  %v1094_v38 = vsel %vm1093_vm3, %v1046_v51, %v1048_v42 }
 0x16e   :  { %858 = vmatprep.subr.mxu1 %v2716_v49  ;;  %1179 = vmatpush1.msra.mxu0 %v1101_v1  ;;  %v1103_v49 = vsel %vm1093_vm3, %v2900_v60, %v2949_v20 }
 0x16f   :  { %859 = vmatpush1.msra.mxu1 %v2637_v29  ;;  %894 = vmatprep.mubr.f32.mxu1 %v2454_v14  ;;  %v1054_v4 = vpop.permute.xlu0 %1053  ;;  %v1072_v46 = vpop.permute.xlu1 %1071 }
 0x170   :  { %860 = vmatprep.subr.mxu1 %v2617_v9  ;;  %1180 = vmatprep.subr.mxu0 %v1095_v61  ;;  %v1105_v11 = vsel %vm1093_vm3, %v2914_v62, %v1072_v46 }
 0x171   :  { %861 = vmatpush1.msra.mxu1 %v2686_v44  ;;  %1853 = vrot.lane.b32.xlu0 %v2706_v48, %s2460_s19 }
 0x172   :  { %2372 = vmatprep.subr.msk.mxu1 %vm439_vm0, %v2581_v22  ;;  %2368 = vmatmul.mubr.msk.f32.vlgmr.msra.gmra.mxu1 %vm435_vm2, %v2924_v40  ;;  %v1111_v22 = vsel %vm1093_vm3, %v2887_v52, %v2806_v59 }
 0x173   :  { %2373 = vmatpush1.msk.msra.mxu1 %vm439_vm0, %v2568_v19  ;;  %1181 = vmatpush1.msra.mxu0 %v1094_v38  ;;  %v1088_v29 = vpop.permute.xlu0 %1087  ;;  %v1076_v9 = vpop.permute.xlu1 %1075  ;;  %v2375_v19 = vld [vmem:[%s3257_s1 + $0x10] sm:$0xff] }
 0x174   :  { %1000 = vmatprep.subr.mxu1 %v2672_v41  ;;  %v1113_v44 = vsel %vm1093_vm3, %v1088_v29, %v1090_v3  ;;  %1036 = vmatprep.mubr.f32.mxu1 %v2454_v14  ;;  %v1112_v41 = vsel %vm1093_vm3, %v2806_v59, %v1088_v29  ;;  %v1097_v59 = vsel %vm1093_vm3, %v2951_v58, %v1054_v4 }
 0x175   :  { %1001 = vmatpush1.msra.mxu1 %v2700_v47  ;;  %1857 = vrot.lane.b32.xlu0 %v2654_v36, %s2460_s19 }
 0x176   :  { %1002 = vmatprep.subr.mxu1 %v2654_v36  ;;  %1214 = vmatprep.mubr.f32.mxu0 %v2454_v14  ;;  %v1110_v36 = vsel %vm1093_vm3, %v2896_v55, %v2887_v52 }
 0x177   :  { %1003 = vmatpush1.msra.mxu1 %v2680_v43  ;;  %2382 = vmatprep.subr.msk.mxu0 %vm439_vm0, %v1113_v44  ;;  %v1092_v47 = vpop.permute.xlu0 %1091  ;;  %v1058_v48 = vpop.permute.xlu1 %1057  ;;  %v1104_v43 = vsel %vm1093_vm3, %v2949_v20, %v2914_v62 }
 0x178   :  { %2379 = vmatprep.subr.msk.mxu1 %vm439_vm0, %v1111_v22  ;;  %2374 = vmatmul.mubr.msk.f32.vlgmr.msra.gmra.mxu1 %vm435_vm2, %v2924_v40  ;;  %v1114_v8 = vsel %vm1093_vm3, %v1090_v3, %v1092_v47 }
 0x179   :  { %2380 = vmatpush1.msk.msra.mxu1 %vm439_vm0, %v1110_v36  ;;  %2378 = vmatmul.mubr.msk.f32.vlgmr.msra.gmra.mxu0 %vm435_vm2, %v2375_v19 }
 0x17a   :  { %1249 = vmatprep.subr.mxu1 %v1104_v43  ;;  %2383 = vmatpush1.msk.msra.mxu0 %vm439_vm0, %v1112_v41 }
 0x17b   :  { %1250 = vmatpush1.msra.mxu1 %v1103_v49  ;;  %1285 = vmatprep.mubr.f32.mxu1 %v2454_v14  ;;  %v1074_v5 = vpop.permute.xlu0 %1073  ;;  %v1479_v6 = vpop.permute.xlu1 %1478 }
 0x17c   :  { %1251 = vmatprep.subr.mxu1 %v1097_v59  ;;  %v1106_v10 = vsel %vm1093_vm3, %v1072_v46, %v1074_v5  ;;  %1356 = vmatprep.mubr.f32.mxu0 %v2454_v14  ;;  %v1107_v12 = vsel %vm1093_vm3, %v1074_v5, %v1076_v9 }
 0x17d   :  { %1252 = vmatpush1.msra.mxu1 %v1096_v7  ;;  %1320 = vmatprep.subr.mxu0 %v1106_v10 }
 0x17e   :  { %2385 = vmatprep.subr.msk.mxu1 %vm439_vm0, %v1092_v47  ;;  %2381 = vmatmul.mubr.msk.f32.vlgmr.msra.gmra.mxu1 %vm435_vm2, %v2375_v19 }
 0x17f   :  { %2386 = vmatpush1.msk.msra.mxu1 %vm439_vm0, %v1114_v8  ;;  %1321 = vmatpush1.msra.mxu0 %v1105_v11  ;;  %v1056_v13 = vpop.permute.xlu0 %1055  ;;  %v1483_v16 = vpop.permute.xlu1 %1482 }
 0x180   :  { %1391 = vmatprep.subr.mxu1 %v1076_v9  ;;  %v1098_v17 = vsel %vm1093_vm3, %v1054_v4, %v1056_v13  ;;  %v1099_v18 = vsel %vm1093_vm3, %v1056_v13, %v1058_v48  ;;  %1427 = vmatprep.mubr.f32.mxu1 %v2454_v14 }
 0x181   :  { %1392 = vmatpush1.msra.mxu1 %v1107_v12  ;;  %1322 = vmatprep.subr.mxu0 %v1099_v18 }
 0x182   :  { %1323 = vmatpush1.msra.mxu0 %v1098_v17  ;;  %2436 = vset.pattern.permute.xlu1 %v2461_v25 }
 0x183   :  { %v1060_v27 = vpop.permute.xlu0 %1059  ;;  %v1477_v28 = vpop.permute.xlu1 %1476  ;;  %2384 = vmatmul.mubr.msk.f32.vlgmr.msra.gmra.mxu0 %vm435_vm2, %v2375_v19  ;;  %2243 = vperm.xlu1 %2436, %v2240_v23  }
 0x184   :  { %v1100_v30 = vsel %vm1093_vm3, %v1058_v48, %v1060_v27  ;;  %1393 = vmatprep.subr.mxu1 %v1060_v27  ;;  %1613 = vmatprep.mubr.f32.mxu0 %v2454_v14  ;;  %v1507_v55 = vsel %vm1492_vm5, %v1477_v28, %v1479_v6 }
 0x185   :  { %1394 = vmatpush1.msra.mxu1 %v1100_v30  ;;  %2279 = vrot.lane.b32.xlu0 %v2414_v26, %s2455_s11 }
 0x186   :  { %2387 = vmatmul.mubr.msk.f32.vlgmr.msra.gmra.mxu1 %vm435_vm2, %v2375_v19  ;;  %2437 = vset.pattern.permute.xlu0 %v2461_v25 }
 0x187   :  { %v1481_v34 = vpop.permute.xlu0 %1480  ;;  %v1465_v52 = vpop.permute.xlu1 %1464  ;;  %1684 = vmatprep.mubr.f32.mxu1 %v2454_v14  ;;  %2281 = vrot.lane.b32.xlu1 %v2415_v31, %s2455_s11 }
 0x188   :  { %v1508_v53 = vsel %vm1492_vm5, %v1479_v6, %v1481_v34  ;;  %v1509_v24 = vsel %vm1492_vm5, %v1481_v34, %v1483_v16 }
 0x189   :  { %2389 = vmatprep.subr.msk.mxu0 %vm439_vm0, %v1508_v53  ;;  %2283 = vrot.lane.b32.xlu0 %v2416_v32, %s2455_s11 }
 0x18a   :  { %2390 = vmatpush1.msk.msra.mxu0 %vm439_vm0, %v1507_v55  ;;  %v2401_v55 = vld [vmem:[%s3257_s1 + $0x20] sm:$0xff] }
 0x18b   :  { %v1485_v60 = vpop.permute.xlu0 %1484  ;;  %v1469_v15 = vpop.permute.xlu1 %1468  ;;  %2285 = vrot.lane.b32.xlu1 %v2417_v54, %s2455_s11 }
 0x18c   :  { %v1510_v62 = vsel %vm1492_vm5, %v1483_v16, %v1485_v60 }
 0x18d   :  { %2392 = vmatprep.subr.msk.mxu1 %vm439_vm0, %v1510_v62 }
 0x18e   :  { %2393 = vmatpush1.msk.msra.mxu1 %vm439_vm0, %v1509_v24 }
 0x18f   :  { %v1463_v63 = vpop.permute.xlu0 %1462  ;;  %v1447_v40 = vpop.permute.xlu1 %1446 }
 0x190   :  { %v1501_v35 = vsel %vm1492_vm5, %v1463_v63, %v1465_v52 }
 0x191   :  { %1577 = vmatprep.subr.mxu0 %v1501_v35 }
 0x193   :  { %v1467_v37 = vpop.permute.xlu0 %1466  ;;  %v1451_v42 = vpop.permute.xlu1 %1450 }
 0x194   :  { %v1502_v56 = vsel %vm1492_vm5, %v1465_v52, %v1467_v37  ;;  %v1503_v20 = vsel %vm1492_vm5, %v1467_v37, %v1469_v15 }
 0x195   :  { %1648 = vmatprep.subr.mxu1 %v1503_v20 }
 0x196   :  { %1649 = vmatpush1.msra.mxu1 %v1502_v56 }
 0x197   :  { %v1461_v58 = vpop.permute.xlu0 %1460  ;;  %v1445_v39 = vpop.permute.xlu1 %1444 }
 0x198   :  { %v1500_v21 = vsel %vm1492_vm5, %v1461_v58, %v1463_v63  ;;  %v1493_v57 = vsel %vm1492_vm5, %v1445_v39, %v1447_v40 }
 0x199   :  { %1578 = vmatpush1.msra.mxu0 %v1500_v21 }
 0x19b   :  { %v1449_v33 = vpop.permute.xlu0 %1448  ;;  %v1489_v50 = vpop.permute.xlu1 %1488 }
 0x19c   :  { %v1494_v51 = vsel %vm1492_vm5, %v1447_v40, %v1449_v33  ;;  %v1495_v3 = vsel %vm1492_vm5, %v1449_v33, %v1451_v42 }
 0x19d   :  { %1579 = vmatprep.subr.mxu0 %v1494_v51 }
 0x19e   :  { %1580 = vmatpush1.msra.mxu0 %v1493_v57 }
 0x19f   :  { %v1453_v0 = vpop.permute.xlu0 %1452  ;;  %v1471_v1 = vpop.permute.xlu1 %1470  ;;  %2391 = vmatmul.mubr.msk.f32.vlgmr.msra.gmra.mxu0 %vm435_vm2, %v2388_v45 }
 0x1a0   :  { %v1496_v2 = vsel %vm1492_vm5, %v1451_v42, %v1453_v0  ;;  %1755 = vmatprep.mubr.f32.mxu0 %v2454_v14  ;;  %v1504_v48 = vsel %vm1492_vm5, %v1469_v15, %v1471_v1 }
 0x1a1   :  { %1650 = vmatprep.subr.mxu1 %v1496_v2 }
 0x1a2   :  { %1651 = vmatpush1.msra.mxu1 %v1495_v3 }
 0x1a3   :  { %v1487_v61 = vpop.permute.xlu0 %1486  ;;  %v1475_v4 = vpop.permute.xlu1 %1474  ;;  %2394 = vmatmul.mubr.msk.f32.vlgmr.msra.gmra.mxu1 %vm435_vm2, %v2388_v45 }
 0x1a4   :  { %v1511_v46 = vsel %vm1492_vm5, %v1485_v60, %v1487_v61  ;;  %v1512_v38 = vsel %vm1492_vm5, %v1487_v61, %v1489_v50  ;;  %1826 = vmatprep.mubr.f32.mxu1 %v2454_v14 }
 0x1a5   :  { %2395 = vmatprep.subr.msk.mxu0 %vm439_vm0, %v1512_v38 }
 0x1a6   :  { %2396 = vmatpush1.msk.msra.mxu0 %vm439_vm0, %v1511_v46 }
 0x1a7   :  { %v1491_v29 = vpop.permute.xlu0 %1490  ;;  %v1457_v9 = vpop.permute.xlu1 %1456 }
 0x1a8   :  { %v1513_v44 = vsel %vm1492_vm5, %v1489_v50, %v1491_v29  ;;  %2398 = vmatprep.subr.msk.mxu1 %vm439_vm0, %v1491_v29 }
 0x1a9   :  { %2399 = vmatpush1.msk.msra.mxu1 %vm439_vm0, %v1513_v44 }
 0x1aa   :  { %1790 = vmatprep.subr.mxu1 %v1475_v4 }
 0x1ab   :  { %v1473_v19 = vpop.permute.xlu0 %1472  ;;  %v1878_v22 = vpop.permute.xlu1 %1877 }
 0x1ac   :  { %v1506_v41 = vsel %vm1492_vm5, %v1473_v19, %v1475_v4  ;;  %v1505_v47 = vsel %vm1492_vm5, %v1471_v1, %v1473_v19 }
 0x1ad   :  { %1719 = vmatprep.subr.mxu0 %v1505_v47  ;;  %1791 = vmatpush1.msra.mxu1 %v1506_v41 }
 0x1ae   :  { %1720 = vmatpush1.msra.mxu0 %v1504_v48 }
 0x1af   :  { %v1455_v36 = vpop.permute.xlu0 %1454 }
 0x1b0   :  { %v1497_v43 = vsel %vm1492_vm5, %v1453_v0, %v1455_v36  ;;  %v1882_v49 = vpop.permute.xlu1 %1881  ;;  %v1498_v59 = vsel %vm1492_vm5, %v1455_v36, %v1457_v9 }
 0x1b1   :  { %1721 = vmatprep.subr.mxu0 %v1498_v59 }
 0x1b2   :  { %1722 = vmatpush1.msra.mxu0 %v1497_v43 }
 0x1b3   :  { %v1459_v5 = vpop.permute.xlu0 %1458  ;;  %2397 = vmatmul.mubr.msk.f32.vlgmr.msra.gmra.mxu0 %vm435_vm2, %v2388_v45 }
 0x1b4   :  { %v1499_v6 = vsel %vm1492_vm5, %v1457_v9, %v1459_v5  ;;  %v1876_v7 = vpop.permute.xlu1 %1875  ;;  %1792 = vmatprep.subr.mxu1 %v1459_v5  ;;  %2012 = vmatprep.mubr.f32.mxu0 %v2454_v14 }
 0x1b5   :  { %1793 = vmatpush1.msra.mxu1 %v1499_v6  ;;  %v1906_v12 = vsel %vm1891_vm6, %v1876_v7, %v1878_v22 }
 0x1b6   :  { %2400 = vmatmul.mubr.msk.f32.vlgmr.msra.gmra.mxu1 %vm435_vm2, %v2388_v45 }
 0x1b7   :  { %v1880_v8 = vpop.permute.xlu0 %1879  ;;  %2083 = vmatprep.mubr.f32.mxu1 %v2454_v14 }
 0x1b8   :  { %v1907_v10 = vsel %vm1891_vm6, %v1878_v22, %v1880_v8  ;;  %v1864_v11 = vpop.permute.xlu1 %1863  ;;  %v1908_v18 = vsel %vm1891_vm6, %v1880_v8, %v1882_v49 }
 0x1b9   :  { %2402 = vmatprep.subr.msk.mxu0 %vm439_vm0, %v1907_v10 }
 0x1ba   :  { %2403 = vmatpush1.msk.msra.mxu0 %vm439_vm0, %v1906_v12 }
 0x1bb   :  { %v1884_v13 = vpop.permute.xlu0 %1883 }
 0x1bc   :  { %v1909_v16 = vsel %vm1891_vm6, %v1882_v49, %v1884_v13  ;;  %v1868_v17 = vpop.permute.xlu1 %1867 }
 0x1bd   :  { %2405 = vmatprep.subr.msk.mxu1 %vm439_vm0, %v1909_v16 }
 0x1be   :  { %2406 = vmatpush1.msk.msra.mxu1 %vm439_vm0, %v1908_v18 }
 0x1bf   :  { %v1862_v23 = vpop.permute.xlu0 %1861 }
 0x1c0   :  { %v1846_v25 = vpop.permute.xlu1 %1845  ;;  %v1900_v26 = vsel %vm1891_vm6, %v1862_v23, %v1864_v11 }
 0x1c1   :  { %1976 = vmatprep.subr.mxu0 %v1900_v26 }
 0x1c3   :  { %v1866_v27 = vpop.permute.xlu0 %1865 }
 0x1c4   :  { %v1901_v28 = vsel %vm1891_vm6, %v1864_v11, %v1866_v27  ;;  %v1850_v30 = vpop.permute.xlu1 %1849  ;;  %v1902_v31 = vsel %vm1891_vm6, %v1866_v27, %v1868_v17 }
 0x1c5   :  { %2047 = vmatprep.subr.mxu1 %v1902_v31 }
 0x1c6   :  { %2048 = vmatpush1.msra.mxu1 %v1901_v28 }
 0x1c7   :  { %v1860_v32 = vpop.permute.xlu0 %1859 }
 0x1c8   :  { %v1899_v34 = vsel %vm1891_vm6, %v1860_v32, %v1862_v23  ;;  %v1844_v52 = vpop.permute.xlu1 %1843 }
 0x1c9   :  { %1977 = vmatpush1.msra.mxu0 %v1899_v34  ;;  %v1892_v60 = vsel %vm1891_vm6, %v1844_v52, %v1846_v25 }
 0x1cb   :  { %v1848_v53 = vpop.permute.xlu0 %1847 }
 0x1cc   :  { %v1893_v54 = vsel %vm1891_vm6, %v1846_v25, %v1848_v53  ;;  %v1888_v62 = vpop.permute.xlu1 %1887  ;;  %v1894_v63 = vsel %vm1891_vm6, %v1848_v53, %v1850_v30 }
 0x1cd   :  { %1978 = vmatprep.subr.mxu0 %v1893_v54 }
 0x1ce   :  { %1979 = vmatpush1.msra.mxu0 %v1892_v60 }
 0x1cf   :  { %v1852_v15 = vpop.permute.xlu0 %1851  ;;  %2404 = vmatmul.mubr.msk.f32.vlgmr.msra.gmra.mxu0 %vm435_vm2, %v2401_v55 }
 0x1d0   :  { %v1895_v24 = vsel %vm1891_vm6, %v1850_v30, %v1852_v15  ;;  %2154 = vmatprep.mubr.f32.mxu0 %v2454_v14  ;;  %v1870_v42 = vpop.permute.xlu1 %1869 }
 0x1d1   :  { %2049 = vmatprep.subr.mxu1 %v1895_v24  ;;  %v1903_v33 = vsel %vm1891_vm6, %v1868_v17, %v1870_v42 }
 0x1d2   :  { %2050 = vmatpush1.msra.mxu1 %v1894_v63  ;;  %v2254_v63 = vld [vmem:[%s3259_s3] sm:$0xff] }
 0x1d3   :  { %2407 = vmatmul.mubr.msk.f32.vlgmr.msra.gmra.mxu1 %vm435_vm2, %v2401_v55 }
 0x1d4   :  { %v1886_v40 = vpop.permute.xlu0 %1885  ;;  %2225 = vmatprep.mubr.f32.mxu1 %v2454_v14 }
 0x1d5   :  { %v1910_v35 = vsel %vm1891_vm6, %v1884_v13, %v1886_v40  ;;  %v1911_v37 = vsel %vm1891_vm6, %v1886_v40, %v1888_v62  ;;  %v1874_v58 = vpop.permute.xlu1 %1873 }
 0x1d6   :  { %2408 = vmatprep.subr.msk.mxu0 %vm439_vm0, %v1911_v37 }
 0x1d7   :  { %2409 = vmatpush1.msk.msra.mxu0 %vm439_vm0, %v1910_v35 }
 0x1da   :  { %v1890_v56 = vpop.permute.xlu0 %1889 }
 0x1db   :  { %v1912_v20 = vsel %vm1891_vm6, %v1888_v62, %v1890_v56  ;;  %2411 = vmatprep.subr.msk.mxu1 %vm439_vm0, %v1890_v56  ;;  %v1856_v50 = vpop.permute.xlu1 %1855 }
 0x1dc   :  { %2412 = vmatpush1.msk.msra.mxu1 %vm439_vm0, %v1912_v20 }
 0x1dd   :  { %2189 = vmatprep.subr.mxu1 %v1874_v58 }
 0x1df   :  { %v1872_v39 = vpop.permute.xlu0 %1871 }
 0x1e0   :  { %v1905_v14 = vsel %vm1891_vm6, %v1872_v39, %v1874_v58  ;;  %v1904_v21 = vsel %vm1891_vm6, %v1870_v42, %v1872_v39  ;;  %v2255_v42 = vld [vmem:[%s3259_s3 + $0x8] sm:$0xff] }
 0x1e1   :  { %2118 = vmatprep.subr.mxu0 %v1904_v21  ;;  %2190 = vmatpush1.msra.mxu1 %v1905_v14  ;;  %v2256_v21 = vld [vmem:[%s3259_s3 + $0x10] sm:$0xff] }
 0x1e2   :  { %2119 = vmatpush1.msra.mxu0 %v1903_v33 }
 0x1e3   :  { %v1854_v51 = vpop.permute.xlu0 %1853 }
 0x1e4   :  { %v1896_v45 = vsel %vm1891_vm6, %v1852_v15, %v1854_v51  ;;  %v1897_v57 = vsel %vm1891_vm6, %v1854_v51, %v1856_v50 }
 0x1e5   :  { %2120 = vmatprep.subr.mxu0 %v1897_v57 }
 0x1e6   :  { %2121 = vmatpush1.msra.mxu0 %v1896_v45 }
 0x1e7   :  { %v1858_v0 = vpop.permute.xlu0 %1857  ;;  %2410 = vmatmul.mubr.msk.f32.vlgmr.msra.gmra.mxu0 %vm435_vm2, %v2401_v55 }
 0x1e8   :  { %v1898_v1 = vsel %vm1891_vm6, %v1856_v50, %v1858_v0  ;;  %2191 = vmatprep.subr.mxu1 %v1858_v0  ;;  %v2257_v0 = vld [vmem:[%s3259_s3 + $0x18] sm:$0xff] }
 0x1e9   :  { %2192 = vmatpush1.msra.mxu1 %v1898_v1 }
 0x1ea   :  { %2413 = vmatmul.mubr.msk.f32.vlgmr.msra.gmra.mxu1 %vm435_vm2, %v2401_v55 }
 0x1f7   :  { %v2280_v1 = vpop.permute.xlu0 %2279 }
 0x1fe   :  { %v3185_v54 = vpop.permute.xlu1 %2243 }
 0x20b   :  { %v522_v2 = vpop.f32.mrf.mxu0 }
 0x20d   :  { %v524_v3 = vpop.f32.mrf.mxu0 }
 0x217   :  { %v3163_v46 = vpop.f32.mrf.mxu0 }
 0x219   :  { %v3165_v38 = vpop.f32.mrf.mxu0 }
 0x21f   :  { %v825_v44 = vpop.f32.mrf.mxu0 }
 0x220   :  { %v826_v13 = vadd.f32 %v825_v44, %v522_v2 }
 0x221   :  { %v827_v19 = vpop.f32.mrf.mxu0 }
 0x222   :  { %v828_v18 = vadd.f32 %v827_v19, %v524_v3 }
 0x224   :  { %v593_v61 = vpop.f32.mrf.mxu1 }
 0x226   :  { %v595_v4 = vpop.f32.mrf.mxu1 }
 0x228   :  { %v3171_v47 = vpop.f32.mrf.mxu0 }
 0x22a   :  { %v3173_v48 = vpop.f32.mrf.mxu0 }
 0x22c   :  { %v3167_v29 = vpop.f32.mrf.mxu1 }
 0x22e   :  { %v3169_v9 = vpop.f32.mrf.mxu1 }
 0x232   :  { %v896_v22 = vpop.f32.mrf.mxu1 }
 0x233   :  { %v897_v25 = vadd.f32 %v896_v22, %v593_v61 }
 0x234   :  { %v898_v41 = vpop.f32.mrf.mxu1 }
 0x235   :  { %v899_v28 = vadd.f32 %v898_v41, %v595_v4 }
 0x238   :  { %v3175_v36 = vpop.f32.mrf.mxu1 }
 0x239   :  { %v1216_v49 = vpop.f32.mrf.mxu0 }
 0x23a   :  { %v3177_v43 = vpop.f32.mrf.mxu1  ;;  %v1434_v26 = vadd.f32 %v1216_v49, %v826_v13  ;;  %v968_v49 = vadd.f32 %v3171_v47, %v3163_v46  ;;  %v2282_v13 = vpop.permute.xlu1 %2281 }
 0x23b   :  { %v1218_v59 = vpop.f32.mrf.mxu0 }
 0x23c   :  { %v1435_v30 = vadd.f32 %v1218_v59, %v828_v18  ;;  %v970_v59 = vadd.f32 %v3173_v48, %v3165_v38 }
 0x23e   :  { %v1287_v5 = vpop.f32.mrf.mxu1 }
 0x23f   :  { %v1436_v34 = vadd.f32 %v1287_v5, %v897_v25  ;;  %v1039_v5 = vadd.f32 %v3175_v36, %v3167_v29 }
 0x240   :  { %v1289_v6 = vpop.f32.mrf.mxu1 }
 0x241   :  { %v1437_v55 = vadd.f32 %v1289_v6, %v899_v28  ;;  %v2286_v28 = vpop.permute.xlu1 %2285 }
 0x243   :  { %v1358_v7 = vpop.f32.mrf.mxu0 }
 0x244   :  { %v1438_v6 = vadd.f32 %v1358_v7, %v968_v49 }
 0x245   :  { %v3179_v8 = vpop.f32.mrf.mxu0 }
 0x246   :  { %v3181_v10 = vpop.f32.mrf.mxu1  ;;  %v1439_v46 = vadd.f32 %v3179_v8, %v970_v59 }
 0x247   :  { %v1440_v47 = vadd.f32 %v3181_v10, %v1039_v5 }
 0x248   :  { %v3183_v11 = vpop.f32.mrf.mxu1 }
 0x25f   :  { %v1615_v12 = vpop.f32.mrf.mxu0 }
 0x260   :  { %v1833_v52 = vadd.f32 %v1615_v12, %v1434_v26  ;;  %v1041_v12 = vadd.f32 %v3177_v43, %v3169_v9  ;;  %v2287_v43 = vsel %vm171_vm13, %v2280_v1, %v2282_v13 }
 0x261   :  { %v1617_v16 = vpop.f32.mrf.mxu0 }
 0x262   :  { %v1834_v60 = vadd.f32 %v1617_v16, %v1435_v30 }
 0x263   :  { %v1686_v17 = vpop.f32.mrf.mxu1 }
 0x264   :  { %v1835_v40 = vadd.f32 %v1686_v17, %v1436_v34  ;;  %v1441_v17 = vadd.f32 %v3183_v11, %v1041_v12 }
 0x265   :  { %v1688_v27 = vpop.f32.mrf.mxu1 }
 0x266   :  { %v1836_v20 = vadd.f32 %v1688_v27, %v1437_v55  ;;  %v2284_v27 = vpop.permute.xlu0 %2283 }
 0x267   :  { %v2288_v10 = vsel %vm171_vm13, %v2282_v13, %v2284_v27 }
 0x273   :  { %v1757_v23 = vpop.f32.mrf.mxu0 }
 0x274   :  { %v1837_v16 = vadd.f32 %v1757_v23, %v1438_v6 }
 0x275   :  { %v1759_v31 = vpop.f32.mrf.mxu0 }
 0x276   :  { %v1828_v32 = vpop.f32.mrf.mxu1  ;;  %v1838_v25 = vadd.f32 %v1759_v31, %v1439_v46  ;;  %v2289_v31 = vsel %vm171_vm13, %v2284_v27, %v2286_v28 }
 0x277   :  { %v1839_v38 = vadd.f32 %v1828_v32, %v1440_v47 }
 0x278   :  { %v1830_v62 = vpop.f32.mrf.mxu1 }
 0x279   :  { %v1840_v9 = vadd.f32 %v1830_v62, %v1441_v17 }
 0x28f   :  { %v2014_v53 = vpop.f32.mrf.mxu0 }
 0x290   :  { %v2232_v15 = vadd.f32 %v2014_v53, %v1833_v52 }
 0x291   :  { %v2016_v24 = vpop.f32.mrf.mxu0 }
 0x292   :  { %v2233_v35 = vadd.f32 %v2016_v24, %v1834_v60  ;;  %v2246_v37 = vadd.f32 %v3185_v54, %v2232_v15 }
 0x293   :  { %v2085_v56 = vpop.f32.mrf.mxu1 }
 0x294   :  { %v2247_v58 = vadd.f32 %v3185_v54, %v2233_v35  ;;  %v2258_v39 = vadd.f32 %v2254_v63, %v2246_v37  ;;  %v2234_v14 = vadd.f32 %v2085_v56, %v1835_v40 }
 0x295   :  { %v2087_v33 = vpop.f32.mrf.mxu1 }
 0x296   :  { %v2259_v50 = vadd.f32 %v2255_v42, %v2247_v58  ;;  %v2262_v51 = vmax.f32 %v2258_v39, 0.0  ;;  %v2248_v45 = vadd.f32 %v3185_v54, %v2234_v14  ;;  %v2235_v57 = vadd.f32 %v2087_v33, %v1836_v20 }
 0x298   :  { %v2263_v2 = vmax.f32 %v2259_v50, 0.0  ;;  %v2260_v3 = vadd.f32 %v2256_v21, %v2248_v45  ;;  %2266 = vst [vmem:[%s3260_s4] sm:$0xff] %v2262_v51  ;;  %v2249_v61 = vadd.f32 %v3185_v54, %v2235_v57 }
 0x29a   :  { %v2264_v4 = vmax.f32 %v2260_v3, 0.0  ;;  %2267 = vst [vmem:[%s3260_s4 + $0x8] sm:$0xff] %v2263_v2  ;;  %v2261_v44 = vadd.f32 %v2257_v0, %v2249_v61  ;;  %v2295_v19 = vadd.f32 %v2280_v1, %v2249_v61 }
 0x29c   :  { %2268 = vst [vmem:[%s3260_s4 + $0x10] sm:$0xff] %v2264_v4  ;;  %v2265_v22 = vmax.f32 %v2261_v44, 0.0  ;;  %v2300_v41 = vmax.f32 %v2295_v19, 0.0 }
 0x29e   :  { %2269 = vst.msk [vmem:[%s3260_s4 + $0x18] sm:$0xff] %vm171_vm13, %v2265_v22  ;;  %2310 = vrot.lane.b32.xlu0 %v2300_v41, %s2448_s21 }
 0x2a7   :  { %v2156_v18 = vpop.f32.mrf.mxu0 }
 0x2a8   :  { %v2236_v26 = vadd.f32 %v2156_v18, %v1837_v16 }
 0x2a9   :  { %v2158_v48 = vpop.f32.mrf.mxu0 }
 0x2aa   :  { %v2250_v29 = vadd.f32 %v3185_v54, %v2236_v26  ;;  %v2237_v36 = vadd.f32 %v2158_v48, %v1838_v25  ;;  %v2227_v7 = vpop.f32.mrf.mxu1 }
 0x2ab   :  { %v2238_v8 = vadd.f32 %v2227_v7, %v1839_v38 }
 0x2ac   :  { %v2296_v23 = vadd.f32 %v2287_v43, %v2250_v29  ;;  %v2251_v11 = vadd.f32 %v3185_v54, %v2237_v36  ;;  %v2229_v30 = vpop.f32.mrf.mxu1 }
 0x2ad   :  { %v2252_v32 = vadd.f32 %v3185_v54, %v2238_v8  ;;  %v2239_v34 = vadd.f32 %v2229_v30, %v1840_v9 }
 0x2ae   :  { %v2301_v52 = vmax.f32 %v2296_v23, 0.0  ;;  %v2297_v53 = vadd.f32 %v2288_v10, %v2251_v11 }
 0x2af   :  { %v2253_v55 = vadd.f32 %v3185_v54, %v2239_v34  ;;  %v2298_v60 = vadd.f32 %v2289_v31, %v2252_v32 }
 0x2b0   :  { %v2302_v15 = vmax.f32 %v2297_v53, 0.0  ;;  %2312 = vrot.lane.b32.xlu1 %v2301_v52, %s2448_s21 }
 0x2b1   :  { %v2299_v62 = vadd.f32 %v2286_v28, %v2253_v55  ;;  %v2303_v24 = vmax.f32 %v2298_v60, 0.0 }
 0x2b2   :  { %2314 = vrot.lane.b32.xlu0 %v2302_v15, %s2448_s21 }
 0x2b3   :  { %v2304_v63 = vmax.f32 %v2299_v62, 0.0 }
 0x2b4   :  { %2316 = vrot.lane.b32.xlu1 %v2303_v24, %s2448_s21 }
 0x2b6   :  { %2318 = vrot.lane.b32.xlu0 %v2304_v63, %s2448_s21 }
 0x310   :  { %v2311_v40 = vpop.permute.xlu0 %2310 }
 0x322   :  { %v2313_v35 = vpop.permute.xlu1 %2312 }
 0x323   :  { %v2320_v37 = vsel %vm143_vm4, %v2311_v40, %v2313_v35 }
 0x324   :  { %2418 = vst [vmem:[%s3260_s4 + $0x20] sm:$0xff] %v2320_v37  ;;  %v2315_v54 = vpop.permute.xlu0 %2314 }
 0x325   :  { %v2321_v42 = vsel %vm143_vm4, %v2313_v35, %v2315_v54 }
 0x326   :  { %2419 = vst [vmem:[%s3260_s4 + $0x28] sm:$0xff] %v2321_v42  ;;  %v2317_v56 = vpop.permute.xlu1 %2316 }
 0x327   :  { %v2322_v20 = vsel %vm143_vm4, %v2315_v54, %v2317_v56 }
 0x328   :  { %2420 = vst [vmem:[%s3260_s4 + $0x30] sm:$0xff] %v2322_v20  ;;  %v2319_v58 = vpop.permute.xlu0 %2318 }
 0x329   :  { %v2323_v39 = vsel %vm143_vm4, %v2317_v56, %v2319_v58 }
 0x32a   :  { %2421 = vst.msk [vmem:[%s3260_s4 + $0x38] sm:$0xff] %vm171_vm13, %v2323_v39 }

</bundles_post_ra>
